<compile_context>
chip_gen: v7x
topology: tpu7x:2x2x1
jax: 0.10.0
libtpu: 0.0.40
codegen_flags: <defaults>
</compile_context>

<pallas_src>
import math
import functools

import jax
import jax.numpy as jnp
from jax import lax
from jax.experimental import pallas as pl
from jax.experimental.pallas import tpu as pltpu

VMEM = pltpu.MemorySpace.VMEM


def _round_up(x, m):
    return ((x + m - 1) // m) * m


class _SlabBuilder:
    """Packs every f32 parameter into one lane-dense (R, 128) slab.

    Every block starts at a sublane offset that is a multiple of 8 and its
    payload starts at lane 0, so every in-kernel access is a cheap static
    window of a single resident VMEM buffer (one DMA for all parameters).
    """

    def __init__(self, width=128):
        self.width = width
        self.blocks = []
        self.off = {}
        self.n = 0

    def add(self, name, arr):
        arr = jnp.asarray(arr, jnp.float32)
        if arr.ndim == 1:
            arr = arr[None, :]
        r, c = arr.shape
        rp = _round_up(r, 8)
        blk = jnp.zeros((rp, self.width), jnp.float32).at[:r, :c].set(arr)
        self.off[name] = self.n
        self.blocks.append(blk)
        self.n += rp

    def build(self):
        return jnp.concatenate(self.blocks, axis=0), dict(self.off)


# ------------------------------ fused kernel -------------------------------

def fused_forward_kernel(ids_ref, edge_ref, w_ref, out_ref, *,
                         off, H, nhead, num_gcn_layers, num_encoder_layers,
                         dim_ff, N, Np, S, Vp, Mp, Ep):
    f32 = jnp.float32
    hd = H // nhead
    FF = dim_ff

    def mat(name, rows, cols, r0=0):
        o = off[name] + r0
        return w_ref[o:o + rows, 0:cols]

    def layernorm(v, g, b):
        mu = jnp.mean(v, axis=-1, keepdims=True)
        c = v - mu
        var = jnp.mean(c * c, axis=-1, keepdims=True)
        return c * lax.rsqrt(var + 1e-5) * g + b

    # ---------------- constants (hoisted, built once) -----------------------
    lane_h = lax.broadcasted_iota(jnp.int32, (1, H), 1)
    head_masks = [((lane_h >= hh * hd) & (lane_h < (hh + 1) * hd)).astype(f32)
                  for hh in range(nhead)]
    pad_row = jnp.where(
        lax.broadcasted_iota(jnp.int32, (1, Np), 1) < N, 0.0, -1e30).astype(f32)

    # -------- in-kernel glue: embedding lookups as one-hot matmuls ----------
    node_ids = ids_ref[0:Np, :]                                      # (Np,1) int32
    met_ids = ids_ref[Np:Np + S, :]                                  # (S,1)  int32
    oh_x = (node_ids == lax.broadcasted_iota(jnp.int32, (Np, Vp), 1)).astype(f32)
    x = jnp.dot(oh_x, mat("embed", Vp, H), preferred_element_type=f32)     # (Np,H)
    oh_m = (met_ids == lax.broadcasted_iota(jnp.int32, (S, Mp), 1)).astype(f32)
    t = (jnp.dot(oh_m, mat("metric", Mp, H), preferred_element_type=f32)
         + mat("pe", S, H))                                          # + positional enc.

    # -------- in-kernel glue: normalized adjacency via one-hot matmul -------
    e_src = edge_ref[0:1, :]                                         # (1,Ep)
    e_dst = edge_ref[1:2, :]
    node_iota = lax.broadcasted_iota(jnp.int32, (Np, Ep), 0)
    m_src = (e_src == node_iota).astype(f32)                         # (Np,Ep)
    m_dst = (e_dst == node_iota).astype(f32)
    adj = lax.dot_general(m_dst, m_src, (((1,), (1,)), ((), ())),
                          preferred_element_type=f32)                # scatter-add on MXU
    eye = (lax.broadcasted_iota(jnp.int32, (Np, Np), 0)
           == lax.broadcasted_iota(jnp.int32, (Np, Np), 1)).astype(f32)
    adj = adj * (1.0 - eye) + eye     # add_remaining_self_loops: diagonal forced to 1
    deg = jnp.sum(adj, axis=-1, keepdims=True)                       # (Np,1), >= 1
    dinv = lax.rsqrt(deg)             # D^-1/2 folded into the layer below

    # ----------------------------- GCN branch -------------------------------
    h = x
    readouts = []
    for i in range(num_gcn_layers):                                  # static unroll
        w = mat(f"gcn_w{i}", H, H)
        vec = mat(f"gcn_v{i}", 3, H)
        b = vec[0:1, :]
        gw = vec[1:2, :]
        gb = vec[2:3, 0:1]
        xw = dinv * jnp.dot(h, w, preferred_element_type=f32)
        h = jnp.maximum(dinv * jnp.dot(adj, xw, preferred_element_type=f32) + b, 0.0)
        # gate computed transposed -> (1,Np) so the pooled readout is a plain matvec
        gate = jax.nn.sigmoid(
            lax.dot_general(gw, h, (((1,), (1,)), ((), ())),
                            preferred_element_type=f32) + gb)        # (1,Np)
        e = jnp.exp(gate + pad_row)       # sigmoid bounded in [0,1] -> no max shift
        r_un = jnp.dot(e, h, preferred_element_type=f32)             # (1,H) on MXU
        den = jnp.sum(e, axis=-1, keepdims=True)
        readouts.append(r_un * pl.reciprocal(den, approx=True))

    # gpool1 over the num_gcn_layers readout vectors
    pool = mat("pool", 4, H)
    gw1, gb1 = pool[0:1, :], pool[1:2, 0:1]
    gates = [jax.nn.sigmoid(jnp.sum(gw1 * r, axis=-1, keepdims=True) + gb1)
             for r in readouts]                                      # (1,1) each
    exps = [jnp.exp(g) for g in gates]
    den1 = exps[0]
    for e_ in exps[1:]:
        den1 = den1 + e_
    inv1 = pl.reciprocal(den1, approx=True)
    out1 = (exps[0] * inv1) * readouts[0]
    for e_, r in zip(exps[1:], readouts[1:]):
        out1 = out1 + (e_ * inv1) * r                                # (1,H)

    # -------------------------- transformer branch ---------------------------
    for i in range(num_encoder_layers):                              # static unroll
        wq = mat(f"enc_wq{i}", H, H)
        wk = mat(f"enc_wk{i}", H, H)
        wv = mat(f"enc_wv{i}", H, H)
        wo = mat(f"enc_wo{i}", H, H)
        w1 = mat(f"enc_w1{i}", H, FF)
        w2 = mat(f"enc_w2{i}", FF, H)
        vec = mat(f"enc_v{i}", 10, FF)
        bq, bk, bv = vec[0:1, 0:H], vec[1:2, 0:H], vec[2:3, 0:H]
        bo = vec[3:4, 0:H]
        g1, be1 = vec[4:5, 0:H], vec[5:6, 0:H]
        b2 = vec[6:7, 0:H]
        g2, be2 = vec[7:8, 0:H], vec[8:9, 0:H]
        b1 = vec[9:10, 0:FF]

        q = jnp.dot(t, wq, preferred_element_type=f32) + bq   # 1/sqrt(hd) folded into wq,bq
        k = jnp.dot(t, wk, preferred_element_type=f32) + bk
        v = jnp.dot(t, wv, preferred_element_type=f32) + bv

        # per-head attention with lane masks (no lane slices / no concat)
        attn = None
        for hh in range(nhead):                                      # static unroll
            s = lax.dot_general(q * head_masks[hh], k, (((1,), (1,)), ((), ())),
                                preferred_element_type=f32)          # (S,S)
            s = s - jnp.max(s, axis=-1, keepdims=True)
            p = jnp.exp(s)
            p = p * pl.reciprocal(jnp.sum(p, axis=-1, keepdims=True), approx=True)
            o = jnp.dot(p, v, preferred_element_type=f32) * head_masks[hh]
            attn = o if attn is None else attn + o                   # == concat(heads)
        attn = jnp.dot(attn, wo, preferred_element_type=f32) + bo

        x1 = layernorm(t + attn, g1, be1)                            # post-norm 1
        ff = jnp.maximum(jnp.dot(x1, w1, preferred_element_type=f32) + b1, 0.0)
        ff = jnp.dot(ff, w2, preferred_element_type=f32) + b2
        t = layernorm(x1 + ff, g2, be2)                              # post-norm 2

    encn = mat("encn", 2, H)
    t = layernorm(t, encn[0:1, :], encn[1:2, :])                     # final encoder LN

    # gpool2 over the S sequence positions (gate transposed -> MXU matvec)
    gw2, gb2 = pool[2:3, :], pool[3:4, 0:1]
    gate2 = jax.nn.sigmoid(
        lax.dot_general(gw2, t, (((1,), (1,)), ((), ())),
                        preferred_element_type=f32) + gb2)           # (1,S)
    e2 = jnp.exp(gate2)
    out2 = (jnp.dot(e2, t, preferred_element_type=f32)
            * pl.reciprocal(jnp.sum(e2, axis=-1, keepdims=True), approx=True))   # (1,H)

    # ---------------------------------- head ---------------------------------
    # TODO(synk): GlobalSelfAttentionLayer is not defined in the reference source;
    # implemented as a GAT-style projection W:(2H->H) + ELU (the attention softmax
    # over a single element is identically 1).  cat([out1,out2]) @ W is computed as
    # the sum of two (1,H)@(H,H) products to avoid a lane concat.
    a0 = mat("attw", H, H, 0)
    a1 = mat("attw", H, H, H)
    hp = (jnp.dot(out1, a0, preferred_element_type=f32)
          + jnp.dot(out2, a1, preferred_element_type=f32))           # (1,H)
    hp = jnp.where(hp > 0, hp, jnp.exp(hp) - 1.0)                    # ELU

    fcw = mat("fc", H, 2, 0)
    fcb = mat("fc", 1, 2, H)
    logits = jnp.dot(hp, fcw, preferred_element_type=f32) + fcb      # (1,2)
    m = jnp.max(logits, axis=-1, keepdims=True)
    el = jnp.exp(logits - m)
    out_ref[...] = el / jnp.sum(el, axis=-1, keepdims=True)


# ------------------------------ forward pass -------------------------------

def full_model_forward(slab, x_ids, edge_index, edge_attr, metrics_ids, *,
                       off, hidden, nhead, num_gcn_layers, num_encoder_layers,
                       dim_feedforward, Vp, Mp):
    del edge_attr  # unused by the reference forward (GCNConv called w/o edge weights)
    H = hidden
    N = x_ids.shape[0]
    Np = _round_up(N, 8)
    E = edge_index.shape[1]
    Ep = _round_up(E, 8)
    S = metrics_ids.shape[0]

    # Tiny integer-only prologue: pad indices to static, 8-aligned shapes.
    # Pad values are out of the in-kernel iota range, so they contribute nothing.
    node_ids = jnp.pad(x_ids.astype(jnp.int32), (0, Np - N), constant_values=Vp)
    ids = jnp.concatenate(
        [node_ids[:, None], metrics_ids.reshape(S, 1).astype(jnp.int32)], axis=0)
    edges = jnp.pad(edge_index.astype(jnp.int32), ((0, 0), (0, Ep - E)),
                    constant_values=Np)

    kern = functools.partial(
        fused_forward_kernel, off=off, H=H, nhead=nhead,
        num_gcn_layers=num_gcn_layers, num_encoder_layers=num_encoder_layers,
        dim_ff=dim_feedforward, N=N, Np=Np, S=S, Vp=Vp, Mp=Mp, Ep=Ep)

    flops = 2 * (Np * Vp * H + S * Mp * H + Np * Ep * Np
                 + num_gcn_layers * (2 * Np * H * H + 2 * Np * H)
                 + num_encoder_layers * (4 * S * H * H
                                         + 2 * S * H * dim_feedforward
                                         + nhead * 2 * S * S * H)
                 + 3 * H * H)
    transcendentals = (num_gcn_layers * Np
                       + num_encoder_layers * nhead * S * S
                       + 2 * S + 4 * H)
    bytes_accessed = int(slab.size * 4 + ids.size * 4 + edges.size * 4 + 8)

    # TODO(synk): on v7x the GCN and transformer branches could run on the two
    # TensorCores concurrently (pl.core_map); kept single-core for portability.
    out = pl.pallas_call(
        kern,
        out_shape=jax.ShapeDtypeStruct((1, 2), jnp.float32),
        in_specs=[pl.BlockSpec(memory_space=VMEM)] * 3,
        out_specs=pl.BlockSpec(memory_space=VMEM),
        cost_estimate=pl.CostEstimate(flops=flops,
                                      transcendentals=transcendentals,
                                      bytes_accessed=bytes_accessed),
        compiler_params=pltpu.CompilerParams(vmem_limit_bytes=32 * 1024 * 1024),
    )(ids, edges, slab)
    return out                                                       # (1,2), rows sum to 1


# --------------------------------- main ------------------------------------

if __name__ == "__main__":
    # Model hyper-parameters (small, consistent with the module signature).
    vocablen, metriclen = 50, 20
    hidden = 32                  # hidden == d_model
    nhead = 4
    num_gcn_layers = 3
    num_encoder_layers = 2
    dim_feedforward = 64
    max_len = 100

    # Input sizes.
    N_nodes, n_edges, S = 10, 20, 8

    H, FF = hidden, dim_feedforward
    hd = H // nhead
    Vp = _round_up(vocablen, 8)
    Mp = _round_up(metriclen, 8)

    key = jax.random.PRNGKey(0)
    keys = iter(jax.random.split(key, 64))
    nxt = lambda: next(keys)

    def xavier(k, shape, gain=1.0):
        fan_in, fan_out = shape[0], shape[1]
        a = gain * math.sqrt(6.0 / float(fan_in + fan_out))
        return jax.random.uniform(k, shape, jnp.float32, -a, a)

    # ------------------------ raw parameters --------------------------------
    embed = jax.random.normal(nxt(), (vocablen, H), jnp.float32)
    metric_embed = jax.random.normal(nxt(), (metriclen, H), jnp.float32)

    # PositionalEncoding buffer pe[max_len, hidden]
    position = jnp.arange(max_len, dtype=jnp.float32)[:, None]
    div_term = jnp.exp(jnp.arange(0, H, 2, dtype=jnp.float32)
                       * (-math.log(10000.0) / H))
    pe = jnp.zeros((max_len, H), jnp.float32)
    pe = pe.at[:, 0::2].set(jnp.sin(position * div_term))
    pe = pe.at[:, 1::2].set(jnp.cos(position * div_term))

    # -------- pack every f32 parameter into ONE lane-dense (R,128) slab ------
    sb = _SlabBuilder(128)
    sb.add("embed", embed)                 # rows padded to Vp (zeros)
    sb.add("metric", metric_embed)         # rows padded to Mp (zeros)
    sb.add("pe", pe)

    for i in range(num_gcn_layers):
        sb.add(f"gcn_w{i}", xavier(nxt(), (H, H)))
        v = jnp.zeros((3, H), jnp.float32)         # row0: conv bias, row1: gate w, row2[0]: gate b
        v = v.at[1, :].set(xavier(nxt(), (H, 1))[:, 0])
        sb.add(f"gcn_v{i}", v)

    scale = 1.0 / math.sqrt(hd)
    for i in range(num_encoder_layers):
        sb.add(f"enc_wq{i}", xavier(nxt(), (H, H)) * scale)   # 1/sqrt(hd) folded in
        sb.add(f"enc_wk{i}", xavier(nxt(), (H, H)))
        sb.add(f"enc_wv{i}", xavier(nxt(), (H, H)))
        sb.add(f"enc_wo{i}", xavier(nxt(), (H, H)))
        sb.add(f"enc_w1{i}", xavier(nxt(), (H, FF)))
        sb.add(f"enc_w2{i}", xavier(nxt(), (FF, H)))
        # rows: 0 bq*scale, 1 bk, 2 bv, 3 bo, 4 ln1_g, 5 ln1_b, 6 b2, 7 ln2_g, 8 ln2_b, 9 b1
        v = jnp.zeros((10, max(H, FF)), jnp.float32)
        v = v.at[4, :H].set(1.0)
        v = v.at[7, :H].set(1.0)
        sb.add(f"enc_v{i}", v)

    sb.add("encn", jnp.stack([jnp.ones((H,), jnp.float32),
                              jnp.zeros((H,), jnp.float32)]))

    pool = jnp.zeros((4, H), jnp.float32)  # row0 gpool1 w, row1[0] b, row2 gpool2 w, row3[0] b
    pool = pool.at[0, :].set(xavier(nxt(), (H, 1))[:, 0])
    pool = pool.at[2, :].set(xavier(nxt(), (H, 1))[:, 0])
    sb.add("pool", pool)

    sb.add("attw", xavier(nxt(), (2 * H, H), gain=1.414))
    fc_blk = jnp.zeros((H + 1, 2), jnp.float32).at[:H, :].set(xavier(nxt(), (H, 2)))
    sb.add("fc", fc_blk)

    slab, off = sb.build()

    # ------------------------ example inputs ---------------------------------
    x_ids = jax.random.randint(nxt(), (N_nodes,), 0, vocablen)
    edge_index = jax.random.randint(nxt(), (2, n_edges), 0, N_nodes)
    edge_attr = jnp.ones((n_edges, 1), jnp.float32)   # unused by forward (as in reference)
    metrics_ids = jax.random.randint(nxt(), (S, 1), 0, metriclen)

    fwd = jax.jit(functools.partial(
        full_model_forward, off=off, hidden=H, nhead=nhead,
        num_gcn_layers=num_gcn_layers, num_encoder_layers=num_encoder_layers,
        dim_feedforward=FF, Vp=Vp, Mp=Mp))

    out = fwd(slab, x_ids, edge_index, edge_attr, metrics_ids)
    jax.block_until_ready(out)
    assert out.shape == (1, 2)
    print("KERNEL_OK")
</pallas_src>

<mosaic_0001>
module attributes {stable_mosaic.version = 11 : i64} {
  func.func @fused_forward_kernel(%arg0: memref<24x1xi32, #tpu.memory_space<vmem>>, %arg1: memref<2x24xi32, #tpu.memory_space<vmem>>, %arg2: memref<904x128xf32, #tpu.memory_space<vmem>>, %arg3: memref<1x2xf32, #tpu.memory_space<vmem>>) attributes {dimension_semantics = [], scalar_prefetch = 0 : i64, scratch_operands = 0 : i64, tpu.core_type = #tpu.core_type<tc>} {
    %0 = tpu.iota {dimensions = array<i32: 1>} : vector<1x32xi32>
    %c0_i32 = arith.constant 0 : i32
    %1 = vector.broadcast %c0_i32 : i32 to vector<1x32xi32>
    %2 = arith.cmpi sge, %0, %1 : vector<1x32xi32>
    %c8_i32 = arith.constant 8 : i32
    %3 = vector.broadcast %c8_i32 : i32 to vector<1x32xi32>
    %4 = arith.cmpi slt, %0, %3 : vector<1x32xi32>
    %5 = arith.andi %2, %4 : vector<1x32xi1>
    %6 = arith.extui %5 : vector<1x32xi1> to vector<1x32xi32>
    %7 = arith.sitofp %6 : vector<1x32xi32> to vector<1x32xf32>
    %c8_i32_0 = arith.constant 8 : i32
    %8 = vector.broadcast %c8_i32_0 : i32 to vector<1x32xi32>
    %9 = arith.cmpi sge, %0, %8 : vector<1x32xi32>
    %c16_i32 = arith.constant 16 : i32
    %10 = vector.broadcast %c16_i32 : i32 to vector<1x32xi32>
    %11 = arith.cmpi slt, %0, %10 : vector<1x32xi32>
    %12 = arith.andi %9, %11 : vector<1x32xi1>
    %13 = arith.extui %12 : vector<1x32xi1> to vector<1x32xi32>
    %14 = arith.sitofp %13 : vector<1x32xi32> to vector<1x32xf32>
    %c16_i32_1 = arith.constant 16 : i32
    %15 = vector.broadcast %c16_i32_1 : i32 to vector<1x32xi32>
    %16 = arith.cmpi sge, %0, %15 : vector<1x32xi32>
    %c24_i32 = arith.constant 24 : i32
    %17 = vector.broadcast %c24_i32 : i32 to vector<1x32xi32>
    %18 = arith.cmpi slt, %0, %17 : vector<1x32xi32>
    %19 = arith.andi %16, %18 : vector<1x32xi1>
    %20 = arith.extui %19 : vector<1x32xi1> to vector<1x32xi32>
    %21 = arith.sitofp %20 : vector<1x32xi32> to vector<1x32xf32>
    %c24_i32_2 = arith.constant 24 : i32
    %22 = vector.broadcast %c24_i32_2 : i32 to vector<1x32xi32>
    %23 = arith.cmpi sge, %0, %22 : vector<1x32xi32>
    %c32_i32 = arith.constant 32 : i32
    %24 = vector.broadcast %c32_i32 : i32 to vector<1x32xi32>
    %25 = arith.cmpi slt, %0, %24 : vector<1x32xi32>
    %26 = arith.andi %23, %25 : vector<1x32xi1>
    %27 = arith.extui %26 : vector<1x32xi1> to vector<1x32xi32>
    %28 = arith.sitofp %27 : vector<1x32xi32> to vector<1x32xf32>
    %29 = tpu.iota {dimensions = array<i32: 1>} : vector<1x16xi32>
    %c10_i32 = arith.constant 10 : i32
    %30 = vector.broadcast %c10_i32 : i32 to vector<1x16xi32>
    %31 = arith.cmpi slt, %29, %30 : vector<1x16xi32>
    %cst = arith.constant 0.000000e+00 : f32
    %cst_3 = arith.constant -1.000000e+30 : f32
    %32 = vector.broadcast %cst : f32 to vector<1x16xf32>
    %33 = vector.broadcast %cst_3 : f32 to vector<1x16xf32>
    %34 = arith.select %31, %32, %33 : vector<1x16xi1>, vector<1x16xf32>
    %c0 = arith.constant 0 : index
    %c0_4 = arith.constant 0 : index
    %35 = vector.load %arg0[%c0, %c0_4] : memref<24x1xi32, #tpu.memory_space<vmem>>, vector<16x1xi32>
    %c16 = arith.constant 16 : index
    %c0_5 = arith.constant 0 : index
    %36 = vector.load %arg0[%c16, %c0_5] : memref<24x1xi32, #tpu.memory_space<vmem>>, vector<8x1xi32>
    %37 = tpu.iota {dimensions = array<i32: 1>} : vector<16x56xi32>
    %38 = vector.broadcast %35 : vector<16x1xi32> to vector<16x56xi32>
    %39 = arith.cmpi eq, %38, %37 : vector<16x56xi32>
    %40 = arith.extui %39 : vector<16x56xi1> to vector<16x56xi32>
    %41 = arith.sitofp %40 : vector<16x56xi32> to vector<16x56xf32>
    %c0_6 = arith.constant 0 : index
    %c0_7 = arith.constant 0 : index
    %42 = vector.load %arg2[%c0_6, %c0_7] : memref<904x128xf32, #tpu.memory_space<vmem>>, vector<56x32xf32>
    %cst_8 = arith.constant dense<0.000000e+00> : vector<16x32xf32>
    %43 = tpu.matmul %41, %42, %cst_8 {dimension_numbers = #tpu.dot_dimension_numbers<[1], [0], [0], [1], [0, 0, 1, 1], [], []>} : vector<16x56xf32>, vector<56x32xf32>, vector<16x32xf32> -> vector<16x32xf32>
    %44 = tpu.iota {dimensions = array<i32: 1>} : vector<8x24xi32>
    %45 = vector.broadcast %36 : vector<8x1xi32> to vector<8x24xi32>
    %46 = arith.cmpi eq, %45, %44 : vector<8x24xi32>
    %47 = arith.extui %46 : vector<8x24xi1> to vector<8x24xi32>
    %48 = arith.sitofp %47 : vector<8x24xi32> to vector<8x24xf32>
    %c56 = arith.constant 56 : index
    %c0_9 = arith.constant 0 : index
    %49 = vector.load %arg2[%c56, %c0_9] : memref<904x128xf32, #tpu.memory_space<vmem>>, vector<24x32xf32>
    %cst_10 = arith.constant dense<0.000000e+00> : vector<8x32xf32>
    %50 = tpu.matmul %48, %49, %cst_10 {dimension_numbers = #tpu.dot_dimension_numbers<[1], [0], [0], [1], [0, 0, 1, 1], [], []>} : vector<8x24xf32>, vector<24x32xf32>, vector<8x32xf32> -> vector<8x32xf32>
    %c80 = arith.constant 80 : index
    %c0_11 = arith.constant 0 : index
    %51 = vector.load %arg2[%c80, %c0_11] : memref<904x128xf32, #tpu.memory_space<vmem>>, vector<8x32xf32>
    %52 = arith.addf %50, %51 : vector<8x32xf32>
    %c0_12 = arith.constant 0 : index
    %c0_13 = arith.constant 0 : index
    %53 = vector.load %arg1[%c0_12, %c0_13] : memref<2x24xi32, #tpu.memory_space<vmem>>, vector<1x24xi32>
    %c1 = arith.constant 1 : index
    %c0_14 = arith.constant 0 : index
    %54 = vector.load %arg1[%c1, %c0_14] : memref<2x24xi32, #tpu.memory_space<vmem>>, vector<1x24xi32>
    %55 = tpu.iota {dimensions = array<i32: 0>} : vector<16x24xi32>
    %56 = vector.broadcast %53 : vector<1x24xi32> to vector<16x24xi32>
    %57 = arith.cmpi eq, %56, %55 : vector<16x24xi32>
    %58 = arith.extui %57 : vector<16x24xi1> to vector<16x24xi32>
    %59 = arith.sitofp %58 : vector<16x24xi32> to vector<16x24xf32>
    %60 = vector.broadcast %54 : vector<1x24xi32> to vector<16x24xi32>
    %61 = arith.cmpi eq, %60, %55 : vector<16x24xi32>
    %62 = arith.extui %61 : vector<16x24xi1> to vector<16x24xi32>
    %63 = arith.sitofp %62 : vector<16x24xi32> to vector<16x24xf32>
    %cst_15 = arith.constant dense<0.000000e+00> : vector<16x16xf32>
    %64 = tpu.matmul %63, %59, %cst_15 {dimension_numbers = #tpu.dot_dimension_numbers<[1], [1], [0], [0], [0, 0, 1, 0], [], []>} : vector<16x24xf32>, vector<16x24xf32>, vector<16x16xf32> -> vector<16x16xf32>
    %65 = tpu.iota {dimensions = array<i32: 0>} : vector<16x16xi32>
    %66 = tpu.iota {dimensions = array<i32: 1>} : vector<16x16xi32>
    %67 = arith.cmpi eq, %65, %66 : vector<16x16xi32>
    %68 = arith.extui %67 : vector<16x16xi1> to vector<16x16xi32>
    %69 = arith.sitofp %68 : vector<16x16xi32> to vector<16x16xf32>
    %cst_16 = arith.constant 1.000000e+00 : f32
    %70 = vector.broadcast %cst_16 : f32 to vector<16x16xf32>
    %71 = arith.subf %70, %69 : vector<16x16xf32>
    %72 = arith.mulf %64, %71 : vector<16x16xf32>
    %73 = arith.addf %72, %69 : vector<16x16xf32>
    %cst_17 = arith.constant dense<0.000000e+00> : vector<16xf32>
    %74 = vector.multi_reduction <add>, %73, %cst_17 [1] : vector<16x16xf32> to vector<16xf32>
    %75 = vector.shape_cast %74 : vector<16xf32> to vector<16x1xf32>
    %76 = math.rsqrt %75 : vector<16x1xf32>
    %c184 = arith.constant 184 : index
    %c0_18 = arith.constant 0 : index
    %77 = vector.load %arg2[%c184, %c0_18] : memref<904x128xf32, #tpu.memory_space<vmem>>, vector<32x32xf32>
    %c216 = arith.constant 216 : index
    %c0_19 = arith.constant 0 : index
    %78 = vector.load %arg2[%c216, %c0_19] : memref<904x128xf32, #tpu.memory_space<vmem>>, vector<3x32xf32>
    %79 = vector.extract_strided_slice %78 {offsets = [0, 0], sizes = [1, 32], strides = [1, 1]} : vector<3x32xf32> to vector<1x32xf32>
    %80 = vector.extract_strided_slice %78 {offsets = [1, 0], sizes = [1, 32], strides = [1, 1]} : vector<3x32xf32> to vector<1x32xf32>
    %81 = vector.extract_strided_slice %78 {offsets = [2, 0], sizes = [1, 1], strides = [1, 1]} : vector<3x32xf32> to vector<1x1xf32>
    %cst_20 = arith.constant dense<0.000000e+00> : vector<16x32xf32>
    %82 = tpu.matmul %43, %77, %cst_20 {dimension_numbers = #tpu.dot_dimension_numbers<[1], [0], [0], [1], [0, 0, 1, 1], [], []>} : vector<16x32xf32>, vector<32x32xf32>, vector<16x32xf32> -> vector<16x32xf32>
    %83 = vector.broadcast %76 : vector<16x1xf32> to vector<16x32xf32>
    %84 = arith.mulf %83, %82 : vector<16x32xf32>
    %cst_21 = arith.constant dense<0.000000e+00> : vector<16x32xf32>
    %85 = tpu.matmul %73, %84, %cst_21 {dimension_numbers = #tpu.dot_dimension_numbers<[1], [0], [0], [1], [0, 0, 1, 1], [], []>} : vector<16x16xf32>, vector<16x32xf32>, vector<16x32xf32> -> vector<16x32xf32>
    %86 = vector.broadcast %76 : vector<16x1xf32> to vector<16x32xf32>
    %87 = arith.mulf %86, %85 : vector<16x32xf32>
    %88 = vector.broadcast %79 : vector<1x32xf32> to vector<16x32xf32>
    %89 = arith.addf %87, %88 : vector<16x32xf32>
    %cst_22 = arith.constant 0.000000e+00 : f32
    %90 = vector.broadcast %cst_22 : f32 to vector<16x32xf32>
    %91 = arith.maximumf %89, %90 : vector<16x32xf32>
    %cst_23 = arith.constant dense<0.000000e+00> : vector<1x16xf32>
    %92 = tpu.matmul %80, %91, %cst_23 {dimension_numbers = #tpu.dot_dimension_numbers<[1], [1], [0], [0], [0, 0, 1, 0], [], []>} : vector<1x32xf32>, vector<16x32xf32>, vector<1x16xf32> -> vector<1x16xf32>
    %93 = vector.broadcast %81 : vector<1x1xf32> to vector<1x16xf32>
    %94 = arith.addf %92, %93 : vector<1x16xf32>
    %95 = arith.negf %94 : vector<1x16xf32>
    %96 = math.exp %95 : vector<1x16xf32>
    %cst_24 = arith.constant 1.000000e+00 : f32
    %97 = vector.broadcast %cst_24 : f32 to vector<1x16xf32>
    %98 = arith.addf %97, %96 : vector<1x16xf32>
    %99 = arith.divf %97, %98 : vector<1x16xf32>
    %100 = arith.addf %99, %34 : vector<1x16xf32>
    %101 = math.exp %100 : vector<1x16xf32>
    %cst_25 = arith.constant dense<0.000000e+00> : vector<1x32xf32>
    %102 = tpu.matmul %101, %91, %cst_25 {dimension_numbers = #tpu.dot_dimension_numbers<[1], [0], [0], [1], [0, 0, 1, 1], [], []>} : vector<1x16xf32>, vector<16x32xf32>, vector<1x32xf32> -> vector<1x32xf32>
    %cst_26 = arith.constant dense<0.000000e+00> : vector<1xf32>
    %103 = vector.multi_reduction <add>, %101, %cst_26 [1] : vector<1x16xf32> to vector<1xf32>
    %104 = vector.shape_cast %103 : vector<1xf32> to vector<1x1xf32>
    %105 = tpu.reciprocal %104 {approx = true} : vector<1x1xf32> -> vector<1x1xf32>
    %106 = vector.broadcast %105 : vector<1x1xf32> to vector<1x32xf32>
    %107 = arith.mulf %102, %106 : vector<1x32xf32>
    %c224 = arith.constant 224 : index
    %c0_27 = arith.constant 0 : index
    %108 = vector.load %arg2[%c224, %c0_27] : memref<904x128xf32, #tpu.memory_space<vmem>>, vector<32x32xf32>
    %c256 = arith.constant 256 : index
    %c0_28 = arith.constant 0 : index
    %109 = vector.load %arg2[%c256, %c0_28] : memref<904x128xf32, #tpu.memory_space<vmem>>, vector<3x32xf32>
    %110 = vector.extract_strided_slice %109 {offsets = [0, 0], sizes = [1, 32], strides = [1, 1]} : vector<3x32xf32> to vector<1x32xf32>
    %111 = vector.extract_strided_slice %109 {offsets = [1, 0], sizes = [1, 32], strides = [1, 1]} : vector<3x32xf32> to vector<1x32xf32>
    %112 = vector.extract_strided_slice %109 {offsets = [2, 0], sizes = [1, 1], strides = [1, 1]} : vector<3x32xf32> to vector<1x1xf32>
    %cst_29 = arith.constant dense<0.000000e+00> : vector<16x32xf32>
    %113 = tpu.matmul %91, %108, %cst_29 {dimension_numbers = #tpu.dot_dimension_numbers<[1], [0], [0], [1], [0, 0, 1, 1], [], []>} : vector<16x32xf32>, vector<32x32xf32>, vector<16x32xf32> -> vector<16x32xf32>
    %114 = vector.broadcast %76 : vector<16x1xf32> to vector<16x32xf32>
    %115 = arith.mulf %114, %113 : vector<16x32xf32>
    %cst_30 = arith.constant dense<0.000000e+00> : vector<16x32xf32>
    %116 = tpu.matmul %73, %115, %cst_30 {dimension_numbers = #tpu.dot_dimension_numbers<[1], [0], [0], [1], [0, 0, 1, 1], [], []>} : vector<16x16xf32>, vector<16x32xf32>, vector<16x32xf32> -> vector<16x32xf32>
    %117 = vector.broadcast %76 : vector<16x1xf32> to vector<16x32xf32>
    %118 = arith.mulf %117, %116 : vector<16x32xf32>
    %119 = vector.broadcast %110 : vector<1x32xf32> to vector<16x32xf32>
    %120 = arith.addf %118, %119 : vector<16x32xf32>
    %cst_31 = arith.constant 0.000000e+00 : f32
    %121 = vector.broadcast %cst_31 : f32 to vector<16x32xf32>
    %122 = arith.maximumf %120, %121 : vector<16x32xf32>
    %cst_32 = arith.constant dense<0.000000e+00> : vector<1x16xf32>
    %123 = tpu.matmul %111, %122, %cst_32 {dimension_numbers = #tpu.dot_dimension_numbers<[1], [1], [0], [0], [0, 0, 1, 0], [], []>} : vector<1x32xf32>, vector<16x32xf32>, vector<1x16xf32> -> vector<1x16xf32>
    %124 = vector.broadcast %112 : vector<1x1xf32> to vector<1x16xf32>
    %125 = arith.addf %123, %124 : vector<1x16xf32>
    %126 = arith.negf %125 : vector<1x16xf32>
    %127 = math.exp %126 : vector<1x16xf32>
    %cst_33 = arith.constant 1.000000e+00 : f32
    %128 = vector.broadcast %cst_33 : f32 to vector<1x16xf32>
    %129 = arith.addf %128, %127 : vector<1x16xf32>
    %130 = arith.divf %128, %129 : vector<1x16xf32>
    %131 = arith.addf %130, %34 : vector<1x16xf32>
    %132 = math.exp %131 : vector<1x16xf32>
    %cst_34 = arith.constant dense<0.000000e+00> : vector<1x32xf32>
    %133 = tpu.matmul %132, %122, %cst_34 {dimension_numbers = #tpu.dot_dimension_numbers<[1], [0], [0], [1], [0, 0, 1, 1], [], []>} : vector<1x16xf32>, vector<16x32xf32>, vector<1x32xf32> -> vector<1x32xf32>
    %cst_35 = arith.constant dense<0.000000e+00> : vector<1xf32>
    %134 = vector.multi_reduction <add>, %132, %cst_35 [1] : vector<1x16xf32> to vector<1xf32>
    %135 = vector.shape_cast %134 : vector<1xf32> to vector<1x1xf32>
    %136 = tpu.reciprocal %135 {approx = true} : vector<1x1xf32> -> vector<1x1xf32>
    %137 = vector.broadcast %136 : vector<1x1xf32> to vector<1x32xf32>
    %138 = arith.mulf %133, %137 : vector<1x32xf32>
    %c264 = arith.constant 264 : index
    %c0_36 = arith.constant 0 : index
    %139 = vector.load %arg2[%c264, %c0_36] : memref<904x128xf32, #tpu.memory_space<vmem>>, vector<32x32xf32>
    %c296 = arith.constant 296 : index
    %c0_37 = arith.constant 0 : index
    %140 = vector.load %arg2[%c296, %c0_37] : memref<904x128xf32, #tpu.memory_space<vmem>>, vector<3x32xf32>
    %141 = vector.extract_strided_slice %140 {offsets = [0, 0], sizes = [1, 32], strides = [1, 1]} : vector<3x32xf32> to vector<1x32xf32>
    %142 = vector.extract_strided_slice %140 {offsets = [1, 0], sizes = [1, 32], strides = [1, 1]} : vector<3x32xf32> to vector<1x32xf32>
    %143 = vector.extract_strided_slice %140 {offsets = [2, 0], sizes = [1, 1], strides = [1, 1]} : vector<3x32xf32> to vector<1x1xf32>
    %cst_38 = arith.constant dense<0.000000e+00> : vector<16x32xf32>
    %144 = tpu.matmul %122, %139, %cst_38 {dimension_numbers = #tpu.dot_dimension_numbers<[1], [0], [0], [1], [0, 0, 1, 1], [], []>} : vector<16x32xf32>, vector<32x32xf32>, vector<16x32xf32> -> vector<16x32xf32>
    %145 = vector.broadcast %76 : vector<16x1xf32> to vector<16x32xf32>
    %146 = arith.mulf %145, %144 : vector<16x32xf32>
    %cst_39 = arith.constant dense<0.000000e+00> : vector<16x32xf32>
    %147 = tpu.matmul %73, %146, %cst_39 {dimension_numbers = #tpu.dot_dimension_numbers<[1], [0], [0], [1], [0, 0, 1, 1], [], []>} : vector<16x16xf32>, vector<16x32xf32>, vector<16x32xf32> -> vector<16x32xf32>
    %148 = vector.broadcast %76 : vector<16x1xf32> to vector<16x32xf32>
    %149 = arith.mulf %148, %147 : vector<16x32xf32>
    %150 = vector.broadcast %141 : vector<1x32xf32> to vector<16x32xf32>
    %151 = arith.addf %149, %150 : vector<16x32xf32>
    %cst_40 = arith.constant 0.000000e+00 : f32
    %152 = vector.broadcast %cst_40 : f32 to vector<16x32xf32>
    %153 = arith.maximumf %151, %152 : vector<16x32xf32>
    %cst_41 = arith.constant dense<0.000000e+00> : vector<1x16xf32>
    %154 = tpu.matmul %142, %153, %cst_41 {dimension_numbers = #tpu.dot_dimension_numbers<[1], [1], [0], [0], [0, 0, 1, 0], [], []>} : vector<1x32xf32>, vector<16x32xf32>, vector<1x16xf32> -> vector<1x16xf32>
    %155 = vector.broadcast %143 : vector<1x1xf32> to vector<1x16xf32>
    %156 = arith.addf %154, %155 : vector<1x16xf32>
    %157 = arith.negf %156 : vector<1x16xf32>
    %158 = math.exp %157 : vector<1x16xf32>
    %cst_42 = arith.constant 1.000000e+00 : f32
    %159 = vector.broadcast %cst_42 : f32 to vector<1x16xf32>
    %160 = arith.addf %159, %158 : vector<1x16xf32>
    %161 = arith.divf %159, %160 : vector<1x16xf32>
    %162 = arith.addf %161, %34 : vector<1x16xf32>
    %163 = math.exp %162 : vector<1x16xf32>
    %cst_43 = arith.constant dense<0.000000e+00> : vector<1x32xf32>
    %164 = tpu.matmul %163, %153, %cst_43 {dimension_numbers = #tpu.dot_dimension_numbers<[1], [0], [0], [1], [0, 0, 1, 1], [], []>} : vector<1x16xf32>, vector<16x32xf32>, vector<1x32xf32> -> vector<1x32xf32>
    %cst_44 = arith.constant dense<0.000000e+00> : vector<1xf32>
    %165 = vector.multi_reduction <add>, %163, %cst_44 [1] : vector<1x16xf32> to vector<1xf32>
    %166 = vector.shape_cast %165 : vector<1xf32> to vector<1x1xf32>
    %167 = tpu.reciprocal %166 {approx = true} : vector<1x1xf32> -> vector<1x1xf32>
    %168 = vector.broadcast %167 : vector<1x1xf32> to vector<1x32xf32>
    %169 = arith.mulf %164, %168 : vector<1x32xf32>
    %c792 = arith.constant 792 : index
    %c0_45 = arith.constant 0 : index
    %170 = vector.load %arg2[%c792, %c0_45] : memref<904x128xf32, #tpu.memory_space<vmem>>, vector<4x32xf32>
    %171 = vector.extract_strided_slice %170 {offsets = [0, 0], sizes = [1, 32], strides = [1, 1]} : vector<4x32xf32> to vector<1x32xf32>
    %172 = vector.extract_strided_slice %170 {offsets = [1, 0], sizes = [1, 1], strides = [1, 1]} : vector<4x32xf32> to vector<1x1xf32>
    %173 = arith.mulf %171, %107 : vector<1x32xf32>
    %cst_46 = arith.constant dense<0.000000e+00> : vector<1xf32>
    %174 = vector.multi_reduction <add>, %173, %cst_46 [1] : vector<1x32xf32> to vector<1xf32>
    %175 = vector.shape_cast %174 : vector<1xf32> to vector<1x1xf32>
    %176 = arith.addf %175, %172 : vector<1x1xf32>
    %177 = arith.negf %176 : vector<1x1xf32>
    %178 = math.exp %177 : vector<1x1xf32>
    %cst_47 = arith.constant 1.000000e+00 : f32
    %179 = vector.broadcast %cst_47 : f32 to vector<1x1xf32>
    %180 = arith.addf %179, %178 : vector<1x1xf32>
    %181 = arith.divf %179, %180 : vector<1x1xf32>
    %182 = arith.mulf %171, %138 : vector<1x32xf32>
    %cst_48 = arith.constant dense<0.000000e+00> : vector<1xf32>
    %183 = vector.multi_reduction <add>, %182, %cst_48 [1] : vector<1x32xf32> to vector<1xf32>
    %184 = vector.shape_cast %183 : vector<1xf32> to vector<1x1xf32>
    %185 = arith.addf %184, %172 : vector<1x1xf32>
    %186 = arith.negf %185 : vector<1x1xf32>
    %187 = math.exp %186 : vector<1x1xf32>
    %cst_49 = arith.constant 1.000000e+00 : f32
    %188 = vector.broadcast %cst_49 : f32 to vector<1x1xf32>
    %189 = arith.addf %188, %187 : vector<1x1xf32>
    %190 = arith.divf %188, %189 : vector<1x1xf32>
    %191 = arith.mulf %171, %169 : vector<1x32xf32>
    %cst_50 = arith.constant dense<0.000000e+00> : vector<1xf32>
    %192 = vector.multi_reduction <add>, %191, %cst_50 [1] : vector<1x32xf32> to vector<1xf32>
    %193 = vector.shape_cast %192 : vector<1xf32> to vector<1x1xf32>
    %194 = arith.addf %193, %172 : vector<1x1xf32>
    %195 = arith.negf %194 : vector<1x1xf32>
    %196 = math.exp %195 : vector<1x1xf32>
    %cst_51 = arith.constant 1.000000e+00 : f32
    %197 = vector.broadcast %cst_51 : f32 to vector<1x1xf32>
    %198 = arith.addf %197, %196 : vector<1x1xf32>
    %199 = arith.divf %197, %198 : vector<1x1xf32>
    %200 = math.exp %181 : vector<1x1xf32>
    %201 = math.exp %190 : vector<1x1xf32>
    %202 = math.exp %199 : vector<1x1xf32>
    %203 = arith.addf %200, %201 : vector<1x1xf32>
    %204 = arith.addf %203, %202 : vector<1x1xf32>
    %205 = tpu.reciprocal %204 {approx = true} : vector<1x1xf32> -> vector<1x1xf32>
    %206 = arith.mulf %200, %205 : vector<1x1xf32>
    %207 = vector.broadcast %206 : vector<1x1xf32> to vector<1x32xf32>
    %208 = arith.mulf %207, %107 : vector<1x32xf32>
    %209 = arith.mulf %201, %205 : vector<1x1xf32>
    %210 = vector.broadcast %209 : vector<1x1xf32> to vector<1x32xf32>
    %211 = arith.mulf %210, %138 : vector<1x32xf32>
    %212 = arith.addf %208, %211 : vector<1x32xf32>
    %213 = arith.mulf %202, %205 : vector<1x1xf32>
    %214 = vector.broadcast %213 : vector<1x1xf32> to vector<1x32xf32>
    %215 = arith.mulf %214, %169 : vector<1x32xf32>
    %216 = arith.addf %212, %215 : vector<1x32xf32>
    %c304 = arith.constant 304 : index
    %c0_52 = arith.constant 0 : index
    %217 = vector.load %arg2[%c304, %c0_52] : memref<904x128xf32, #tpu.memory_space<vmem>>, vector<32x32xf32>
    %c336 = arith.constant 336 : index
    %c0_53 = arith.constant 0 : index
    %218 = vector.load %arg2[%c336, %c0_53] : memref<904x128xf32, #tpu.memory_space<vmem>>, vector<32x32xf32>
    %c368 = arith.constant 368 : index
    %c0_54 = arith.constant 0 : index
    %219 = vector.load %arg2[%c368, %c0_54] : memref<904x128xf32, #tpu.memory_space<vmem>>, vector<32x32xf32>
    %c400 = arith.constant 400 : index
    %c0_55 = arith.constant 0 : index
    %220 = vector.load %arg2[%c400, %c0_55] : memref<904x128xf32, #tpu.memory_space<vmem>>, vector<32x32xf32>
    %c432 = arith.constant 432 : index
    %c0_56 = arith.constant 0 : index
    %221 = vector.load %arg2[%c432, %c0_56] : memref<904x128xf32, #tpu.memory_space<vmem>>, vector<32x64xf32>
    %c464 = arith.constant 464 : index
    %c0_57 = arith.constant 0 : index
    %222 = vector.load %arg2[%c464, %c0_57] : memref<904x128xf32, #tpu.memory_space<vmem>>, vector<64x32xf32>
    %c528 = arith.constant 528 : index
    %c0_58 = arith.constant 0 : index
    %223 = vector.load %arg2[%c528, %c0_58] : memref<904x128xf32, #tpu.memory_space<vmem>>, vector<10x64xf32>
    %224 = vector.extract_strided_slice %223 {offsets = [0, 0], sizes = [1, 32], strides = [1, 1]} : vector<10x64xf32> to vector<1x32xf32>
    %225 = vector.extract_strided_slice %223 {offsets = [1, 0], sizes = [1, 32], strides = [1, 1]} : vector<10x64xf32> to vector<1x32xf32>
    %226 = vector.extract_strided_slice %223 {offsets = [2, 0], sizes = [1, 32], strides = [1, 1]} : vector<10x64xf32> to vector<1x32xf32>
    %227 = vector.extract_strided_slice %223 {offsets = [3, 0], sizes = [1, 32], strides = [1, 1]} : vector<10x64xf32> to vector<1x32xf32>
    %228 = vector.extract_strided_slice %223 {offsets = [4, 0], sizes = [1, 32], strides = [1, 1]} : vector<10x64xf32> to vector<1x32xf32>
    %229 = vector.extract_strided_slice %223 {offsets = [5, 0], sizes = [1, 32], strides = [1, 1]} : vector<10x64xf32> to vector<1x32xf32>
    %230 = vector.extract_strided_slice %223 {offsets = [6, 0], sizes = [1, 32], strides = [1, 1]} : vector<10x64xf32> to vector<1x32xf32>
    %231 = vector.extract_strided_slice %223 {offsets = [7, 0], sizes = [1, 32], strides = [1, 1]} : vector<10x64xf32> to vector<1x32xf32>
    %232 = vector.extract_strided_slice %223 {offsets = [8, 0], sizes = [1, 32], strides = [1, 1]} : vector<10x64xf32> to vector<1x32xf32>
    %233 = vector.extract_strided_slice %223 {offsets = [9, 0], sizes = [1, 64], strides = [1, 1]} : vector<10x64xf32> to vector<1x64xf32>
    %cst_59 = arith.constant dense<0.000000e+00> : vector<8x32xf32>
    %234 = tpu.matmul %52, %217, %cst_59 {dimension_numbers = #tpu.dot_dimension_numbers<[1], [0], [0], [1], [0, 0, 1, 1], [], []>} : vector<8x32xf32>, vector<32x32xf32>, vector<8x32xf32> -> vector<8x32xf32>
    %235 = vector.broadcast %224 : vector<1x32xf32> to vector<8x32xf32>
    %236 = arith.addf %234, %235 : vector<8x32xf32>
    %cst_60 = arith.constant dense<0.000000e+00> : vector<8x32xf32>
    %237 = tpu.matmul %52, %218, %cst_60 {dimension_numbers = #tpu.dot_dimension_numbers<[1], [0], [0], [1], [0, 0, 1, 1], [], []>} : vector<8x32xf32>, vector<32x32xf32>, vector<8x32xf32> -> vector<8x32xf32>
    %238 = vector.broadcast %225 : vector<1x32xf32> to vector<8x32xf32>
    %239 = arith.addf %237, %238 : vector<8x32xf32>
    %cst_61 = arith.constant dense<0.000000e+00> : vector<8x32xf32>
    %240 = tpu.matmul %52, %219, %cst_61 {dimension_numbers = #tpu.dot_dimension_numbers<[1], [0], [0], [1], [0, 0, 1, 1], [], []>} : vector<8x32xf32>, vector<32x32xf32>, vector<8x32xf32> -> vector<8x32xf32>
    %241 = vector.broadcast %226 : vector<1x32xf32> to vector<8x32xf32>
    %242 = arith.addf %240, %241 : vector<8x32xf32>
    %243 = vector.broadcast %7 : vector<1x32xf32> to vector<8x32xf32>
    %244 = arith.mulf %236, %243 : vector<8x32xf32>
    %cst_62 = arith.constant dense<0.000000e+00> : vector<8x8xf32>
    %245 = tpu.matmul %244, %239, %cst_62 {dimension_numbers = #tpu.dot_dimension_numbers<[1], [1], [0], [0], [0, 0, 1, 0], [], []>} : vector<8x32xf32>, vector<8x32xf32>, vector<8x8xf32> -> vector<8x8xf32>
    %cst_63 = arith.constant dense<0xFF800000> : vector<8xf32>
    %246 = vector.multi_reduction <maximumf>, %245, %cst_63 [1] : vector<8x8xf32> to vector<8xf32>
    %247 = vector.shape_cast %246 : vector<8xf32> to vector<8x1xf32>
    %248 = vector.broadcast %247 : vector<8x1xf32> to vector<8x8xf32>
    %249 = arith.subf %245, %248 : vector<8x8xf32>
    %250 = math.exp %249 : vector<8x8xf32>
    %cst_64 = arith.constant dense<0.000000e+00> : vector<8xf32>
    %251 = vector.multi_reduction <add>, %250, %cst_64 [1] : vector<8x8xf32> to vector<8xf32>
    %252 = vector.shape_cast %251 : vector<8xf32> to vector<8x1xf32>
    %253 = tpu.reciprocal %252 {approx = true} : vector<8x1xf32> -> vector<8x1xf32>
    %254 = vector.broadcast %253 : vector<8x1xf32> to vector<8x8xf32>
    %255 = arith.mulf %250, %254 : vector<8x8xf32>
    %cst_65 = arith.constant dense<0.000000e+00> : vector<8x32xf32>
    %256 = tpu.matmul %255, %242, %cst_65 {dimension_numbers = #tpu.dot_dimension_numbers<[1], [0], [0], [1], [0, 0, 1, 1], [], []>} : vector<8x8xf32>, vector<8x32xf32>, vector<8x32xf32> -> vector<8x32xf32>
    %257 = vector.broadcast %7 : vector<1x32xf32> to vector<8x32xf32>
    %258 = arith.mulf %256, %257 : vector<8x32xf32>
    %259 = vector.broadcast %14 : vector<1x32xf32> to vector<8x32xf32>
    %260 = arith.mulf %236, %259 : vector<8x32xf32>
    %cst_66 = arith.constant dense<0.000000e+00> : vector<8x8xf32>
    %261 = tpu.matmul %260, %239, %cst_66 {dimension_numbers = #tpu.dot_dimension_numbers<[1], [1], [0], [0], [0, 0, 1, 0], [], []>} : vector<8x32xf32>, vector<8x32xf32>, vector<8x8xf32> -> vector<8x8xf32>
    %cst_67 = arith.constant dense<0xFF800000> : vector<8xf32>
    %262 = vector.multi_reduction <maximumf>, %261, %cst_67 [1] : vector<8x8xf32> to vector<8xf32>
    %263 = vector.shape_cast %262 : vector<8xf32> to vector<8x1xf32>
    %264 = vector.broadcast %263 : vector<8x1xf32> to vector<8x8xf32>
    %265 = arith.subf %261, %264 : vector<8x8xf32>
    %266 = math.exp %265 : vector<8x8xf32>
    %cst_68 = arith.constant dense<0.000000e+00> : vector<8xf32>
    %267 = vector.multi_reduction <add>, %266, %cst_68 [1] : vector<8x8xf32> to vector<8xf32>
    %268 = vector.shape_cast %267 : vector<8xf32> to vector<8x1xf32>
    %269 = tpu.reciprocal %268 {approx = true} : vector<8x1xf32> -> vector<8x1xf32>
    %270 = vector.broadcast %269 : vector<8x1xf32> to vector<8x8xf32>
    %271 = arith.mulf %266, %270 : vector<8x8xf32>
    %cst_69 = arith.constant dense<0.000000e+00> : vector<8x32xf32>
    %272 = tpu.matmul %271, %242, %cst_69 {dimension_numbers = #tpu.dot_dimension_numbers<[1], [0], [0], [1], [0, 0, 1, 1], [], []>} : vector<8x8xf32>, vector<8x32xf32>, vector<8x32xf32> -> vector<8x32xf32>
    %273 = vector.broadcast %14 : vector<1x32xf32> to vector<8x32xf32>
    %274 = arith.mulf %272, %273 : vector<8x32xf32>
    %275 = arith.addf %258, %274 : vector<8x32xf32>
    %276 = vector.broadcast %21 : vector<1x32xf32> to vector<8x32xf32>
    %277 = arith.mulf %236, %276 : vector<8x32xf32>
    %cst_70 = arith.constant dense<0.000000e+00> : vector<8x8xf32>
    %278 = tpu.matmul %277, %239, %cst_70 {dimension_numbers = #tpu.dot_dimension_numbers<[1], [1], [0], [0], [0, 0, 1, 0], [], []>} : vector<8x32xf32>, vector<8x32xf32>, vector<8x8xf32> -> vector<8x8xf32>
    %cst_71 = arith.constant dense<0xFF800000> : vector<8xf32>
    %279 = vector.multi_reduction <maximumf>, %278, %cst_71 [1] : vector<8x8xf32> to vector<8xf32>
    %280 = vector.shape_cast %279 : vector<8xf32> to vector<8x1xf32>
    %281 = vector.broadcast %280 : vector<8x1xf32> to vector<8x8xf32>
    %282 = arith.subf %278, %281 : vector<8x8xf32>
    %283 = math.exp %282 : vector<8x8xf32>
    %cst_72 = arith.constant dense<0.000000e+00> : vector<8xf32>
    %284 = vector.multi_reduction <add>, %283, %cst_72 [1] : vector<8x8xf32> to vector<8xf32>
    %285 = vector.shape_cast %284 : vector<8xf32> to vector<8x1xf32>
    %286 = tpu.reciprocal %285 {approx = true} : vector<8x1xf32> -> vector<8x1xf32>
    %287 = vector.broadcast %286 : vector<8x1xf32> to vector<8x8xf32>
    %288 = arith.mulf %283, %287 : vector<8x8xf32>
    %cst_73 = arith.constant dense<0.000000e+00> : vector<8x32xf32>
    %289 = tpu.matmul %288, %242, %cst_73 {dimension_numbers = #tpu.dot_dimension_numbers<[1], [0], [0], [1], [0, 0, 1, 1], [], []>} : vector<8x8xf32>, vector<8x32xf32>, vector<8x32xf32> -> vector<8x32xf32>
    %290 = vector.broadcast %21 : vector<1x32xf32> to vector<8x32xf32>
    %291 = arith.mulf %289, %290 : vector<8x32xf32>
    %292 = arith.addf %275, %291 : vector<8x32xf32>
    %293 = vector.broadcast %28 : vector<1x32xf32> to vector<8x32xf32>
    %294 = arith.mulf %236, %293 : vector<8x32xf32>
    %cst_74 = arith.constant dense<0.000000e+00> : vector<8x8xf32>
    %295 = tpu.matmul %294, %239, %cst_74 {dimension_numbers = #tpu.dot_dimension_numbers<[1], [1], [0], [0], [0, 0, 1, 0], [], []>} : vector<8x32xf32>, vector<8x32xf32>, vector<8x8xf32> -> vector<8x8xf32>
    %cst_75 = arith.constant dense<0xFF800000> : vector<8xf32>
    %296 = vector.multi_reduction <maximumf>, %295, %cst_75 [1] : vector<8x8xf32> to vector<8xf32>
    %297 = vector.shape_cast %296 : vector<8xf32> to vector<8x1xf32>
    %298 = vector.broadcast %297 : vector<8x1xf32> to vector<8x8xf32>
    %299 = arith.subf %295, %298 : vector<8x8xf32>
    %300 = math.exp %299 : vector<8x8xf32>
    %cst_76 = arith.constant dense<0.000000e+00> : vector<8xf32>
    %301 = vector.multi_reduction <add>, %300, %cst_76 [1] : vector<8x8xf32> to vector<8xf32>
    %302 = vector.shape_cast %301 : vector<8xf32> to vector<8x1xf32>
    %303 = tpu.reciprocal %302 {approx = true} : vector<8x1xf32> -> vector<8x1xf32>
    %304 = vector.broadcast %303 : vector<8x1xf32> to vector<8x8xf32>
    %305 = arith.mulf %300, %304 : vector<8x8xf32>
    %cst_77 = arith.constant dense<0.000000e+00> : vector<8x32xf32>
    %306 = tpu.matmul %305, %242, %cst_77 {dimension_numbers = #tpu.dot_dimension_numbers<[1], [0], [0], [1], [0, 0, 1, 1], [], []>} : vector<8x8xf32>, vector<8x32xf32>, vector<8x32xf32> -> vector<8x32xf32>
    %307 = vector.broadcast %28 : vector<1x32xf32> to vector<8x32xf32>
    %308 = arith.mulf %306, %307 : vector<8x32xf32>
    %309 = arith.addf %292, %308 : vector<8x32xf32>
    %cst_78 = arith.constant dense<0.000000e+00> : vector<8x32xf32>
    %310 = tpu.matmul %309, %220, %cst_78 {dimension_numbers = #tpu.dot_dimension_numbers<[1], [0], [0], [1], [0, 0, 1, 1], [], []>} : vector<8x32xf32>, vector<32x32xf32>, vector<8x32xf32> -> vector<8x32xf32>
    %311 = vector.broadcast %227 : vector<1x32xf32> to vector<8x32xf32>
    %312 = arith.addf %310, %311 : vector<8x32xf32>
    %313 = arith.addf %52, %312 : vector<8x32xf32>
    %cst_79 = arith.constant dense<0.000000e+00> : vector<8xf32>
    %314 = vector.multi_reduction <add>, %313, %cst_79 [1] : vector<8x32xf32> to vector<8xf32>
    %315 = vector.shape_cast %314 : vector<8xf32> to vector<8x1xf32>
    %cst_80 = arith.constant 3.200000e+01 : f32
    %316 = vector.broadcast %cst_80 : f32 to vector<8x1xf32>
    %317 = arith.divf %315, %316 : vector<8x1xf32>
    %318 = vector.broadcast %317 : vector<8x1xf32> to vector<8x32xf32>
    %319 = arith.subf %313, %318 : vector<8x32xf32>
    %320 = arith.mulf %319, %319 : vector<8x32xf32>
    %cst_81 = arith.constant dense<0.000000e+00> : vector<8xf32>
    %321 = vector.multi_reduction <add>, %320, %cst_81 [1] : vector<8x32xf32> to vector<8xf32>
    %322 = vector.shape_cast %321 : vector<8xf32> to vector<8x1xf32>
    %cst_82 = arith.constant 3.200000e+01 : f32
    %323 = vector.broadcast %cst_82 : f32 to vector<8x1xf32>
    %324 = arith.divf %322, %323 : vector<8x1xf32>
    %cst_83 = arith.constant 9.99999974E-6 : f32
    %325 = vector.broadcast %cst_83 : f32 to vector<8x1xf32>
    %326 = arith.addf %324, %325 : vector<8x1xf32>
    %327 = math.rsqrt %326 : vector<8x1xf32>
    %328 = vector.broadcast %327 : vector<8x1xf32> to vector<8x32xf32>
    %329 = arith.mulf %319, %328 : vector<8x32xf32>
    %330 = vector.broadcast %228 : vector<1x32xf32> to vector<8x32xf32>
    %331 = arith.mulf %329, %330 : vector<8x32xf32>
    %332 = vector.broadcast %229 : vector<1x32xf32> to vector<8x32xf32>
    %333 = arith.addf %331, %332 : vector<8x32xf32>
    %cst_84 = arith.constant dense<0.000000e+00> : vector<8x64xf32>
    %334 = tpu.matmul %333, %221, %cst_84 {dimension_numbers = #tpu.dot_dimension_numbers<[1], [0], [0], [1], [0, 0, 1, 1], [], []>} : vector<8x32xf32>, vector<32x64xf32>, vector<8x64xf32> -> vector<8x64xf32>
    %335 = vector.broadcast %233 : vector<1x64xf32> to vector<8x64xf32>
    %336 = arith.addf %334, %335 : vector<8x64xf32>
    %cst_85 = arith.constant 0.000000e+00 : f32
    %337 = vector.broadcast %cst_85 : f32 to vector<8x64xf32>
    %338 = arith.maximumf %336, %337 : vector<8x64xf32>
    %cst_86 = arith.constant dense<0.000000e+00> : vector<8x32xf32>
    %339 = tpu.matmul %338, %222, %cst_86 {dimension_numbers = #tpu.dot_dimension_numbers<[1], [0], [0], [1], [0, 0, 1, 1], [], []>} : vector<8x64xf32>, vector<64x32xf32>, vector<8x32xf32> -> vector<8x32xf32>
    %340 = vector.broadcast %230 : vector<1x32xf32> to vector<8x32xf32>
    %341 = arith.addf %339, %340 : vector<8x32xf32>
    %342 = arith.addf %333, %341 : vector<8x32xf32>
    %cst_87 = arith.constant dense<0.000000e+00> : vector<8xf32>
    %343 = vector.multi_reduction <add>, %342, %cst_87 [1] : vector<8x32xf32> to vector<8xf32>
    %344 = vector.shape_cast %343 : vector<8xf32> to vector<8x1xf32>
    %cst_88 = arith.constant 3.200000e+01 : f32
    %345 = vector.broadcast %cst_88 : f32 to vector<8x1xf32>
    %346 = arith.divf %344, %345 : vector<8x1xf32>
    %347 = vector.broadcast %346 : vector<8x1xf32> to vector<8x32xf32>
    %348 = arith.subf %342, %347 : vector<8x32xf32>
    %349 = arith.mulf %348, %348 : vector<8x32xf32>
    %cst_89 = arith.constant dense<0.000000e+00> : vector<8xf32>
    %350 = vector.multi_reduction <add>, %349, %cst_89 [1] : vector<8x32xf32> to vector<8xf32>
    %351 = vector.shape_cast %350 : vector<8xf32> to vector<8x1xf32>
    %cst_90 = arith.constant 3.200000e+01 : f32
    %352 = vector.broadcast %cst_90 : f32 to vector<8x1xf32>
    %353 = arith.divf %351, %352 : vector<8x1xf32>
    %cst_91 = arith.constant 9.99999974E-6 : f32
    %354 = vector.broadcast %cst_91 : f32 to vector<8x1xf32>
    %355 = arith.addf %353, %354 : vector<8x1xf32>
    %356 = math.rsqrt %355 : vector<8x1xf32>
    %357 = vector.broadcast %356 : vector<8x1xf32> to vector<8x32xf32>
    %358 = arith.mulf %348, %357 : vector<8x32xf32>
    %359 = vector.broadcast %231 : vector<1x32xf32> to vector<8x32xf32>
    %360 = arith.mulf %358, %359 : vector<8x32xf32>
    %361 = vector.broadcast %232 : vector<1x32xf32> to vector<8x32xf32>
    %362 = arith.addf %360, %361 : vector<8x32xf32>
    %c544 = arith.constant 544 : index
    %c0_92 = arith.constant 0 : index
    %363 = vector.load %arg2[%c544, %c0_92] : memref<904x128xf32, #tpu.memory_space<vmem>>, vector<32x32xf32>
    %c576 = arith.constant 576 : index
    %c0_93 = arith.constant 0 : index
    %364 = vector.load %arg2[%c576, %c0_93] : memref<904x128xf32, #tpu.memory_space<vmem>>, vector<32x32xf32>
    %c608 = arith.constant 608 : index
    %c0_94 = arith.constant 0 : index
    %365 = vector.load %arg2[%c608, %c0_94] : memref<904x128xf32, #tpu.memory_space<vmem>>, vector<32x32xf32>
    %c640 = arith.constant 640 : index
    %c0_95 = arith.constant 0 : index
    %366 = vector.load %arg2[%c640, %c0_95] : memref<904x128xf32, #tpu.memory_space<vmem>>, vector<32x32xf32>
    %c672 = arith.constant 672 : index
    %c0_96 = arith.constant 0 : index
    %367 = vector.load %arg2[%c672, %c0_96] : memref<904x128xf32, #tpu.memory_space<vmem>>, vector<32x64xf32>
    %c704 = arith.constant 704 : index
    %c0_97 = arith.constant 0 : index
    %368 = vector.load %arg2[%c704, %c0_97] : memref<904x128xf32, #tpu.memory_space<vmem>>, vector<64x32xf32>
    %c768 = arith.constant 768 : index
    %c0_98 = arith.constant 0 : index
    %369 = vector.load %arg2[%c768, %c0_98] : memref<904x128xf32, #tpu.memory_space<vmem>>, vector<10x64xf32>
    %370 = vector.extract_strided_slice %369 {offsets = [0, 0], sizes = [1, 32], strides = [1, 1]} : vector<10x64xf32> to vector<1x32xf32>
    %371 = vector.extract_strided_slice %369 {offsets = [1, 0], sizes = [1, 32], strides = [1, 1]} : vector<10x64xf32> to vector<1x32xf32>
    %372 = vector.extract_strided_slice %369 {offsets = [2, 0], sizes = [1, 32], strides = [1, 1]} : vector<10x64xf32> to vector<1x32xf32>
    %373 = vector.extract_strided_slice %369 {offsets = [3, 0], sizes = [1, 32], strides = [1, 1]} : vector<10x64xf32> to vector<1x32xf32>
    %374 = vector.extract_strided_slice %369 {offsets = [4, 0], sizes = [1, 32], strides = [1, 1]} : vector<10x64xf32> to vector<1x32xf32>
    %375 = vector.extract_strided_slice %369 {offsets = [5, 0], sizes = [1, 32], strides = [1, 1]} : vector<10x64xf32> to vector<1x32xf32>
    %376 = vector.extract_strided_slice %369 {offsets = [6, 0], sizes = [1, 32], strides = [1, 1]} : vector<10x64xf32> to vector<1x32xf32>
    %377 = vector.extract_strided_slice %369 {offsets = [7, 0], sizes = [1, 32], strides = [1, 1]} : vector<10x64xf32> to vector<1x32xf32>
    %378 = vector.extract_strided_slice %369 {offsets = [8, 0], sizes = [1, 32], strides = [1, 1]} : vector<10x64xf32> to vector<1x32xf32>
    %379 = vector.extract_strided_slice %369 {offsets = [9, 0], sizes = [1, 64], strides = [1, 1]} : vector<10x64xf32> to vector<1x64xf32>
    %cst_99 = arith.constant dense<0.000000e+00> : vector<8x32xf32>
    %380 = tpu.matmul %362, %363, %cst_99 {dimension_numbers = #tpu.dot_dimension_numbers<[1], [0], [0], [1], [0, 0, 1, 1], [], []>} : vector<8x32xf32>, vector<32x32xf32>, vector<8x32xf32> -> vector<8x32xf32>
    %381 = vector.broadcast %370 : vector<1x32xf32> to vector<8x32xf32>
    %382 = arith.addf %380, %381 : vector<8x32xf32>
    %cst_100 = arith.constant dense<0.000000e+00> : vector<8x32xf32>
    %383 = tpu.matmul %362, %364, %cst_100 {dimension_numbers = #tpu.dot_dimension_numbers<[1], [0], [0], [1], [0, 0, 1, 1], [], []>} : vector<8x32xf32>, vector<32x32xf32>, vector<8x32xf32> -> vector<8x32xf32>
    %384 = vector.broadcast %371 : vector<1x32xf32> to vector<8x32xf32>
    %385 = arith.addf %383, %384 : vector<8x32xf32>
    %cst_101 = arith.constant dense<0.000000e+00> : vector<8x32xf32>
    %386 = tpu.matmul %362, %365, %cst_101 {dimension_numbers = #tpu.dot_dimension_numbers<[1], [0], [0], [1], [0, 0, 1, 1], [], []>} : vector<8x32xf32>, vector<32x32xf32>, vector<8x32xf32> -> vector<8x32xf32>
    %387 = vector.broadcast %372 : vector<1x32xf32> to vector<8x32xf32>
    %388 = arith.addf %386, %387 : vector<8x32xf32>
    %389 = vector.broadcast %7 : vector<1x32xf32> to vector<8x32xf32>
    %390 = arith.mulf %382, %389 : vector<8x32xf32>
    %cst_102 = arith.constant dense<0.000000e+00> : vector<8x8xf32>
    %391 = tpu.matmul %390, %385, %cst_102 {dimension_numbers = #tpu.dot_dimension_numbers<[1], [1], [0], [0], [0, 0, 1, 0], [], []>} : vector<8x32xf32>, vector<8x32xf32>, vector<8x8xf32> -> vector<8x8xf32>
    %cst_103 = arith.constant dense<0xFF800000> : vector<8xf32>
    %392 = vector.multi_reduction <maximumf>, %391, %cst_103 [1] : vector<8x8xf32> to vector<8xf32>
    %393 = vector.shape_cast %392 : vector<8xf32> to vector<8x1xf32>
    %394 = vector.broadcast %393 : vector<8x1xf32> to vector<8x8xf32>
    %395 = arith.subf %391, %394 : vector<8x8xf32>
    %396 = math.exp %395 : vector<8x8xf32>
    %cst_104 = arith.constant dense<0.000000e+00> : vector<8xf32>
    %397 = vector.multi_reduction <add>, %396, %cst_104 [1] : vector<8x8xf32> to vector<8xf32>
    %398 = vector.shape_cast %397 : vector<8xf32> to vector<8x1xf32>
    %399 = tpu.reciprocal %398 {approx = true} : vector<8x1xf32> -> vector<8x1xf32>
    %400 = vector.broadcast %399 : vector<8x1xf32> to vector<8x8xf32>
    %401 = arith.mulf %396, %400 : vector<8x8xf32>
    %cst_105 = arith.constant dense<0.000000e+00> : vector<8x32xf32>
    %402 = tpu.matmul %401, %388, %cst_105 {dimension_numbers = #tpu.dot_dimension_numbers<[1], [0], [0], [1], [0, 0, 1, 1], [], []>} : vector<8x8xf32>, vector<8x32xf32>, vector<8x32xf32> -> vector<8x32xf32>
    %403 = vector.broadcast %7 : vector<1x32xf32> to vector<8x32xf32>
    %404 = arith.mulf %402, %403 : vector<8x32xf32>
    %405 = vector.broadcast %14 : vector<1x32xf32> to vector<8x32xf32>
    %406 = arith.mulf %382, %405 : vector<8x32xf32>
    %cst_106 = arith.constant dense<0.000000e+00> : vector<8x8xf32>
    %407 = tpu.matmul %406, %385, %cst_106 {dimension_numbers = #tpu.dot_dimension_numbers<[1], [1], [0], [0], [0, 0, 1, 0], [], []>} : vector<8x32xf32>, vector<8x32xf32>, vector<8x8xf32> -> vector<8x8xf32>
    %cst_107 = arith.constant dense<0xFF800000> : vector<8xf32>
    %408 = vector.multi_reduction <maximumf>, %407, %cst_107 [1] : vector<8x8xf32> to vector<8xf32>
    %409 = vector.shape_cast %408 : vector<8xf32> to vector<8x1xf32>
    %410 = vector.broadcast %409 : vector<8x1xf32> to vector<8x8xf32>
    %411 = arith.subf %407, %410 : vector<8x8xf32>
    %412 = math.exp %411 : vector<8x8xf32>
    %cst_108 = arith.constant dense<0.000000e+00> : vector<8xf32>
    %413 = vector.multi_reduction <add>, %412, %cst_108 [1] : vector<8x8xf32> to vector<8xf32>
    %414 = vector.shape_cast %413 : vector<8xf32> to vector<8x1xf32>
    %415 = tpu.reciprocal %414 {approx = true} : vector<8x1xf32> -> vector<8x1xf32>
    %416 = vector.broadcast %415 : vector<8x1xf32> to vector<8x8xf32>
    %417 = arith.mulf %412, %416 : vector<8x8xf32>
    %cst_109 = arith.constant dense<0.000000e+00> : vector<8x32xf32>
    %418 = tpu.matmul %417, %388, %cst_109 {dimension_numbers = #tpu.dot_dimension_numbers<[1], [0], [0], [1], [0, 0, 1, 1], [], []>} : vector<8x8xf32>, vector<8x32xf32>, vector<8x32xf32> -> vector<8x32xf32>
    %419 = vector.broadcast %14 : vector<1x32xf32> to vector<8x32xf32>
    %420 = arith.mulf %418, %419 : vector<8x32xf32>
    %421 = arith.addf %404, %420 : vector<8x32xf32>
    %422 = vector.broadcast %21 : vector<1x32xf32> to vector<8x32xf32>
    %423 = arith.mulf %382, %422 : vector<8x32xf32>
    %cst_110 = arith.constant dense<0.000000e+00> : vector<8x8xf32>
    %424 = tpu.matmul %423, %385, %cst_110 {dimension_numbers = #tpu.dot_dimension_numbers<[1], [1], [0], [0], [0, 0, 1, 0], [], []>} : vector<8x32xf32>, vector<8x32xf32>, vector<8x8xf32> -> vector<8x8xf32>
    %cst_111 = arith.constant dense<0xFF800000> : vector<8xf32>
    %425 = vector.multi_reduction <maximumf>, %424, %cst_111 [1] : vector<8x8xf32> to vector<8xf32>
    %426 = vector.shape_cast %425 : vector<8xf32> to vector<8x1xf32>
    %427 = vector.broadcast %426 : vector<8x1xf32> to vector<8x8xf32>
    %428 = arith.subf %424, %427 : vector<8x8xf32>
    %429 = math.exp %428 : vector<8x8xf32>
    %cst_112 = arith.constant dense<0.000000e+00> : vector<8xf32>
    %430 = vector.multi_reduction <add>, %429, %cst_112 [1] : vector<8x8xf32> to vector<8xf32>
    %431 = vector.shape_cast %430 : vector<8xf32> to vector<8x1xf32>
    %432 = tpu.reciprocal %431 {approx = true} : vector<8x1xf32> -> vector<8x1xf32>
    %433 = vector.broadcast %432 : vector<8x1xf32> to vector<8x8xf32>
    %434 = arith.mulf %429, %433 : vector<8x8xf32>
    %cst_113 = arith.constant dense<0.000000e+00> : vector<8x32xf32>
    %435 = tpu.matmul %434, %388, %cst_113 {dimension_numbers = #tpu.dot_dimension_numbers<[1], [0], [0], [1], [0, 0, 1, 1], [], []>} : vector<8x8xf32>, vector<8x32xf32>, vector<8x32xf32> -> vector<8x32xf32>
    %436 = vector.broadcast %21 : vector<1x32xf32> to vector<8x32xf32>
    %437 = arith.mulf %435, %436 : vector<8x32xf32>
    %438 = arith.addf %421, %437 : vector<8x32xf32>
    %439 = vector.broadcast %28 : vector<1x32xf32> to vector<8x32xf32>
    %440 = arith.mulf %382, %439 : vector<8x32xf32>
    %cst_114 = arith.constant dense<0.000000e+00> : vector<8x8xf32>
    %441 = tpu.matmul %440, %385, %cst_114 {dimension_numbers = #tpu.dot_dimension_numbers<[1], [1], [0], [0], [0, 0, 1, 0], [], []>} : vector<8x32xf32>, vector<8x32xf32>, vector<8x8xf32> -> vector<8x8xf32>
    %cst_115 = arith.constant dense<0xFF800000> : vector<8xf32>
    %442 = vector.multi_reduction <maximumf>, %441, %cst_115 [1] : vector<8x8xf32> to vector<8xf32>
    %443 = vector.shape_cast %442 : vector<8xf32> to vector<8x1xf32>
    %444 = vector.broadcast %443 : vector<8x1xf32> to vector<8x8xf32>
    %445 = arith.subf %441, %444 : vector<8x8xf32>
    %446 = math.exp %445 : vector<8x8xf32>
    %cst_116 = arith.constant dense<0.000000e+00> : vector<8xf32>
    %447 = vector.multi_reduction <add>, %446, %cst_116 [1] : vector<8x8xf32> to vector<8xf32>
    %448 = vector.shape_cast %447 : vector<8xf32> to vector<8x1xf32>
    %449 = tpu.reciprocal %448 {approx = true} : vector<8x1xf32> -> vector<8x1xf32>
    %450 = vector.broadcast %449 : vector<8x1xf32> to vector<8x8xf32>
    %451 = arith.mulf %446, %450 : vector<8x8xf32>
    %cst_117 = arith.constant dense<0.000000e+00> : vector<8x32xf32>
    %452 = tpu.matmul %451, %388, %cst_117 {dimension_numbers = #tpu.dot_dimension_numbers<[1], [0], [0], [1], [0, 0, 1, 1], [], []>} : vector<8x8xf32>, vector<8x32xf32>, vector<8x32xf32> -> vector<8x32xf32>
    %453 = vector.broadcast %28 : vector<1x32xf32> to vector<8x32xf32>
    %454 = arith.mulf %452, %453 : vector<8x32xf32>
    %455 = arith.addf %438, %454 : vector<8x32xf32>
    %cst_118 = arith.constant dense<0.000000e+00> : vector<8x32xf32>
    %456 = tpu.matmul %455, %366, %cst_118 {dimension_numbers = #tpu.dot_dimension_numbers<[1], [0], [0], [1], [0, 0, 1, 1], [], []>} : vector<8x32xf32>, vector<32x32xf32>, vector<8x32xf32> -> vector<8x32xf32>
    %457 = vector.broadcast %373 : vector<1x32xf32> to vector<8x32xf32>
    %458 = arith.addf %456, %457 : vector<8x32xf32>
    %459 = arith.addf %362, %458 : vector<8x32xf32>
    %cst_119 = arith.constant dense<0.000000e+00> : vector<8xf32>
    %460 = vector.multi_reduction <add>, %459, %cst_119 [1] : vector<8x32xf32> to vector<8xf32>
    %461 = vector.shape_cast %460 : vector<8xf32> to vector<8x1xf32>
    %cst_120 = arith.constant 3.200000e+01 : f32
    %462 = vector.broadcast %cst_120 : f32 to vector<8x1xf32>
    %463 = arith.divf %461, %462 : vector<8x1xf32>
    %464 = vector.broadcast %463 : vector<8x1xf32> to vector<8x32xf32>
    %465 = arith.subf %459, %464 : vector<8x32xf32>
    %466 = arith.mulf %465, %465 : vector<8x32xf32>
    %cst_121 = arith.constant dense<0.000000e+00> : vector<8xf32>
    %467 = vector.multi_reduction <add>, %466, %cst_121 [1] : vector<8x32xf32> to vector<8xf32>
    %468 = vector.shape_cast %467 : vector<8xf32> to vector<8x1xf32>
    %cst_122 = arith.constant 3.200000e+01 : f32
    %469 = vector.broadcast %cst_122 : f32 to vector<8x1xf32>
    %470 = arith.divf %468, %469 : vector<8x1xf32>
    %cst_123 = arith.constant 9.99999974E-6 : f32
    %471 = vector.broadcast %cst_123 : f32 to vector<8x1xf32>
    %472 = arith.addf %470, %471 : vector<8x1xf32>
    %473 = math.rsqrt %472 : vector<8x1xf32>
    %474 = vector.broadcast %473 : vector<8x1xf32> to vector<8x32xf32>
    %475 = arith.mulf %465, %474 : vector<8x32xf32>
    %476 = vector.broadcast %374 : vector<1x32xf32> to vector<8x32xf32>
    %477 = arith.mulf %475, %476 : vector<8x32xf32>
    %478 = vector.broadcast %375 : vector<1x32xf32> to vector<8x32xf32>
    %479 = arith.addf %477, %478 : vector<8x32xf32>
    %cst_124 = arith.constant dense<0.000000e+00> : vector<8x64xf32>
    %480 = tpu.matmul %479, %367, %cst_124 {dimension_numbers = #tpu.dot_dimension_numbers<[1], [0], [0], [1], [0, 0, 1, 1], [], []>} : vector<8x32xf32>, vector<32x64xf32>, vector<8x64xf32> -> vector<8x64xf32>
    %481 = vector.broadcast %379 : vector<1x64xf32> to vector<8x64xf32>
    %482 = arith.addf %480, %481 : vector<8x64xf32>
    %cst_125 = arith.constant 0.000000e+00 : f32
    %483 = vector.broadcast %cst_125 : f32 to vector<8x64xf32>
    %484 = arith.maximumf %482, %483 : vector<8x64xf32>
    %cst_126 = arith.constant dense<0.000000e+00> : vector<8x32xf32>
    %485 = tpu.matmul %484, %368, %cst_126 {dimension_numbers = #tpu.dot_dimension_numbers<[1], [0], [0], [1], [0, 0, 1, 1], [], []>} : vector<8x64xf32>, vector<64x32xf32>, vector<8x32xf32> -> vector<8x32xf32>
    %486 = vector.broadcast %376 : vector<1x32xf32> to vector<8x32xf32>
    %487 = arith.addf %485, %486 : vector<8x32xf32>
    %488 = arith.addf %479, %487 : vector<8x32xf32>
    %cst_127 = arith.constant dense<0.000000e+00> : vector<8xf32>
    %489 = vector.multi_reduction <add>, %488, %cst_127 [1] : vector<8x32xf32> to vector<8xf32>
    %490 = vector.shape_cast %489 : vector<8xf32> to vector<8x1xf32>
    %cst_128 = arith.constant 3.200000e+01 : f32
    %491 = vector.broadcast %cst_128 : f32 to vector<8x1xf32>
    %492 = arith.divf %490, %491 : vector<8x1xf32>
    %493 = vector.broadcast %492 : vector<8x1xf32> to vector<8x32xf32>
    %494 = arith.subf %488, %493 : vector<8x32xf32>
    %495 = arith.mulf %494, %494 : vector<8x32xf32>
    %cst_129 = arith.constant dense<0.000000e+00> : vector<8xf32>
    %496 = vector.multi_reduction <add>, %495, %cst_129 [1] : vector<8x32xf32> to vector<8xf32>
    %497 = vector.shape_cast %496 : vector<8xf32> to vector<8x1xf32>
    %cst_130 = arith.constant 3.200000e+01 : f32
    %498 = vector.broadcast %cst_130 : f32 to vector<8x1xf32>
    %499 = arith.divf %497, %498 : vector<8x1xf32>
    %cst_131 = arith.constant 9.99999974E-6 : f32
    %500 = vector.broadcast %cst_131 : f32 to vector<8x1xf32>
    %501 = arith.addf %499, %500 : vector<8x1xf32>
    %502 = math.rsqrt %501 : vector<8x1xf32>
    %503 = vector.broadcast %502 : vector<8x1xf32> to vector<8x32xf32>
    %504 = arith.mulf %494, %503 : vector<8x32xf32>
    %505 = vector.broadcast %377 : vector<1x32xf32> to vector<8x32xf32>
    %506 = arith.mulf %504, %505 : vector<8x32xf32>
    %507 = vector.broadcast %378 : vector<1x32xf32> to vector<8x32xf32>
    %508 = arith.addf %506, %507 : vector<8x32xf32>
    %c784 = arith.constant 784 : index
    %c0_132 = arith.constant 0 : index
    %509 = vector.load %arg2[%c784, %c0_132] : memref<904x128xf32, #tpu.memory_space<vmem>>, vector<2x32xf32>
    %510 = vector.extract_strided_slice %509 {offsets = [0, 0], sizes = [1, 32], strides = [1, 1]} : vector<2x32xf32> to vector<1x32xf32>
    %511 = vector.extract_strided_slice %509 {offsets = [1, 0], sizes = [1, 32], strides = [1, 1]} : vector<2x32xf32> to vector<1x32xf32>
    %cst_133 = arith.constant dense<0.000000e+00> : vector<8xf32>
    %512 = vector.multi_reduction <add>, %508, %cst_133 [1] : vector<8x32xf32> to vector<8xf32>
    %513 = vector.shape_cast %512 : vector<8xf32> to vector<8x1xf32>
    %cst_134 = arith.constant 3.200000e+01 : f32
    %514 = vector.broadcast %cst_134 : f32 to vector<8x1xf32>
    %515 = arith.divf %513, %514 : vector<8x1xf32>
    %516 = vector.broadcast %515 : vector<8x1xf32> to vector<8x32xf32>
    %517 = arith.subf %508, %516 : vector<8x32xf32>
    %518 = arith.mulf %517, %517 : vector<8x32xf32>
    %cst_135 = arith.constant dense<0.000000e+00> : vector<8xf32>
    %519 = vector.multi_reduction <add>, %518, %cst_135 [1] : vector<8x32xf32> to vector<8xf32>
    %520 = vector.shape_cast %519 : vector<8xf32> to vector<8x1xf32>
    %cst_136 = arith.constant 3.200000e+01 : f32
    %521 = vector.broadcast %cst_136 : f32 to vector<8x1xf32>
    %522 = arith.divf %520, %521 : vector<8x1xf32>
    %cst_137 = arith.constant 9.99999974E-6 : f32
    %523 = vector.broadcast %cst_137 : f32 to vector<8x1xf32>
    %524 = arith.addf %522, %523 : vector<8x1xf32>
    %525 = math.rsqrt %524 : vector<8x1xf32>
    %526 = vector.broadcast %525 : vector<8x1xf32> to vector<8x32xf32>
    %527 = arith.mulf %517, %526 : vector<8x32xf32>
    %528 = vector.broadcast %510 : vector<1x32xf32> to vector<8x32xf32>
    %529 = arith.mulf %527, %528 : vector<8x32xf32>
    %530 = vector.broadcast %511 : vector<1x32xf32> to vector<8x32xf32>
    %531 = arith.addf %529, %530 : vector<8x32xf32>
    %532 = vector.extract_strided_slice %170 {offsets = [2, 0], sizes = [1, 32], strides = [1, 1]} : vector<4x32xf32> to vector<1x32xf32>
    %533 = vector.extract_strided_slice %170 {offsets = [3, 0], sizes = [1, 1], strides = [1, 1]} : vector<4x32xf32> to vector<1x1xf32>
    %cst_138 = arith.constant dense<0.000000e+00> : vector<1x8xf32>
    %534 = tpu.matmul %532, %531, %cst_138 {dimension_numbers = #tpu.dot_dimension_numbers<[1], [1], [0], [0], [0, 0, 1, 0], [], []>} : vector<1x32xf32>, vector<8x32xf32>, vector<1x8xf32> -> vector<1x8xf32>
    %535 = vector.broadcast %533 : vector<1x1xf32> to vector<1x8xf32>
    %536 = arith.addf %534, %535 : vector<1x8xf32>
    %537 = arith.negf %536 : vector<1x8xf32>
    %538 = math.exp %537 : vector<1x8xf32>
    %cst_139 = arith.constant 1.000000e+00 : f32
    %539 = vector.broadcast %cst_139 : f32 to vector<1x8xf32>
    %540 = arith.addf %539, %538 : vector<1x8xf32>
    %541 = arith.divf %539, %540 : vector<1x8xf32>
    %542 = math.exp %541 : vector<1x8xf32>
    %cst_140 = arith.constant dense<0.000000e+00> : vector<1x32xf32>
    %543 = tpu.matmul %542, %531, %cst_140 {dimension_numbers = #tpu.dot_dimension_numbers<[1], [0], [0], [1], [0, 0, 1, 1], [], []>} : vector<1x8xf32>, vector<8x32xf32>, vector<1x32xf32> -> vector<1x32xf32>
    %cst_141 = arith.constant dense<0.000000e+00> : vector<1xf32>
    %544 = vector.multi_reduction <add>, %542, %cst_141 [1] : vector<1x8xf32> to vector<1xf32>
    %545 = vector.shape_cast %544 : vector<1xf32> to vector<1x1xf32>
    %546 = tpu.reciprocal %545 {approx = true} : vector<1x1xf32> -> vector<1x1xf32>
    %547 = vector.broadcast %546 : vector<1x1xf32> to vector<1x32xf32>
    %548 = arith.mulf %543, %547 : vector<1x32xf32>
    %c800 = arith.constant 800 : index
    %c0_142 = arith.constant 0 : index
    %549 = vector.load %arg2[%c800, %c0_142] : memref<904x128xf32, #tpu.memory_space<vmem>>, vector<32x32xf32>
    %c832 = arith.constant 832 : index
    %c0_143 = arith.constant 0 : index
    %550 = vector.load %arg2[%c832, %c0_143] : memref<904x128xf32, #tpu.memory_space<vmem>>, vector<32x32xf32>
    %cst_144 = arith.constant dense<0.000000e+00> : vector<1x32xf32>
    %551 = tpu.matmul %216, %549, %cst_144 {dimension_numbers = #tpu.dot_dimension_numbers<[1], [0], [0], [1], [0, 0, 1, 1], [], []>} : vector<1x32xf32>, vector<32x32xf32>, vector<1x32xf32> -> vector<1x32xf32>
    %cst_145 = arith.constant dense<0.000000e+00> : vector<1x32xf32>
    %552 = tpu.matmul %548, %550, %cst_145 {dimension_numbers = #tpu.dot_dimension_numbers<[1], [0], [0], [1], [0, 0, 1, 1], [], []>} : vector<1x32xf32>, vector<32x32xf32>, vector<1x32xf32> -> vector<1x32xf32>
    %553 = arith.addf %551, %552 : vector<1x32xf32>
    %cst_146 = arith.constant 0.000000e+00 : f32
    %554 = vector.broadcast %cst_146 : f32 to vector<1x32xf32>
    %555 = arith.cmpf ogt, %553, %554 : vector<1x32xf32>
    %556 = math.exp %553 : vector<1x32xf32>
    %cst_147 = arith.constant 1.000000e+00 : f32
    %557 = vector.broadcast %cst_147 : f32 to vector<1x32xf32>
    %558 = arith.subf %556, %557 : vector<1x32xf32>
    %559 = arith.select %555, %553, %558 : vector<1x32xi1>, vector<1x32xf32>
    %c864 = arith.constant 864 : index
    %c0_148 = arith.constant 0 : index
    %560 = vector.load %arg2[%c864, %c0_148] : memref<904x128xf32, #tpu.memory_space<vmem>>, vector<32x2xf32>
    %c896 = arith.constant 896 : index
    %c0_149 = arith.constant 0 : index
    %561 = vector.load %arg2[%c896, %c0_149] : memref<904x128xf32, #tpu.memory_space<vmem>>, vector<1x2xf32>
    %cst_150 = arith.constant dense<0.000000e+00> : vector<1x2xf32>
    %562 = tpu.matmul %559, %560, %cst_150 {dimension_numbers = #tpu.dot_dimension_numbers<[1], [0], [0], [1], [0, 0, 1, 1], [], []>} : vector<1x32xf32>, vector<32x2xf32>, vector<1x2xf32> -> vector<1x2xf32>
    %563 = arith.addf %562, %561 : vector<1x2xf32>
    %cst_151 = arith.constant dense<0xFF800000> : vector<1xf32>
    %564 = vector.multi_reduction <maximumf>, %563, %cst_151 [1] : vector<1x2xf32> to vector<1xf32>
    %565 = vector.shape_cast %564 : vector<1xf32> to vector<1x1xf32>
    %566 = vector.broadcast %565 : vector<1x1xf32> to vector<1x2xf32>
    %567 = arith.subf %563, %566 : vector<1x2xf32>
    %568 = math.exp %567 : vector<1x2xf32>
    %cst_152 = arith.constant dense<0.000000e+00> : vector<1xf32>
    %569 = vector.multi_reduction <add>, %568, %cst_152 [1] : vector<1x2xf32> to vector<1xf32>
    %570 = vector.shape_cast %569 : vector<1xf32> to vector<1x1xf32>
    %571 = vector.broadcast %570 : vector<1x1xf32> to vector<1x2xf32>
    %572 = arith.divf %568, %571 : vector<1x2xf32>
    %c0_153 = arith.constant 0 : index
    %c0_154 = arith.constant 0 : index
    %573 = vector.load %arg3[%c0_153, %c0_154] : memref<1x2xf32, #tpu.memory_space<vmem>>, vector<1x2xf32>
    tpu.vector_store %arg3[%c0_153, %c0_154], %572 {strides = array<i32>} : memref<1x2xf32, #tpu.memory_space<vmem>>, vector<1x2xf32>,
    return
  }
}

</mosaic_0001>

<bundles_post_ra>
// kernel: full_model_forward.1
= control target key start
LH: loop header
LB: loop body
LE: loop exit
PB: predicated region body
PF: predicated region fallthrough
CT: control target
= control target key end

     0   :  { %8 = vsyncpa [#allocation3], 0  ;;  %s5884_s0 = inlined_call_operand.vmem [shape: s32[24,1], index: 0, kind: input, shape index: {}]   ;;  %s5885_s1 = inlined_call_operand.vmem [shape: s32[2,24], index: 1, kind: input, shape index: {}]   ;;  %s5886_s2 = inlined_call_operand.hbm [shape: f32[904,128], index: 2, kind: input, shape index: {}]   ;;  %s5887_s3 = inlined_call_operand.hbm [shape: f32[1,2], index: 3, kind: output, shape index: {}]  }
   0x1   :  { %9 = vsyncpa [#allocation4], 0  ;;  %s5314_s12 = smov [#allocation2]   ;;  %s5266_s16 = scalar_lea.hbm %s5886_s2, 14464 }
   0x2   :  { %s19_s13 = sshll.u32 %s5314_s12, 4  ;;  %p5267_p0 = scmp.ne.s32.totalorder %s5886_s2, %s5266_s16  ;;  %s20_s13 = int_to_ptr.vmem [resolvable:$true] %s19_s13 }
   0x3   :  { %p5270_p1 = scmp.lt.u32.totalorder %s5266_s16, %s5886_s2 }
   0x5   :  { %p5272_p2 = pnand %p5270_p1, %p5267_p0 }
   0x7   :  { %5275 = shalt.err (!%p5272_p2)
}
   0x8   :  { %s5276_s21 = scalar_lea.vmem %s20_s13, 14464  ;;  %p5281_p4 = scmp.lt.s32.totalorder %s20_s13, %s20_s13 }
   0x9   :  { %p5277_p3 = scmp.ne.s32.totalorder %s20_s13, %s5276_s21  ;;  %p5282_p5 = scmp.lt.s32.totalorder %s5276_s21, %s5276_s21 }
   0xb   :  { %p5283_p6 = por %p5282_p5, %p5281_p4 }
   0xd   :  { %p5284_p7 = pnand %p5283_p6, %p5277_p3 }
   0xf   :  { %5287 = shalt.err (!%p5284_p7)
}
  0x10   :  { %s5315_s22 = smov 128   ;;  %s5316_s23 = smov 8  }
  0x11   :  { %25 = dma.hbm_to_vmem [thread:$0]  %s5886_s2, 14464, %s20_s13, [#allocation3], %s5315_s22, %s5315_s22, %s5316_s23  }
  0x12   :  { %5310 = dma.done.wait [#allocation3], 14464  }
  0x13   :  { %5311 = vsyncadd [#allocation3], 4294952832  ;;  %v29_v0 = vlaneseq  ;;  %v5317_v1 = vmov 0   ;;  %v5318_v2 = vmov 0.0|0.0   ;;  %v55_v4 = vld [vmem:[%s5884_s0 + $0x10] sm:$0xff]  ;;  %v53_v5 = vld [vmem:[%s5884_s0] sm:$0xff] }
  0x14   :  { %5161 = vset.pattern.permute.xlu1 %v5317_v1  ;;  %5160 = vset.pattern.permute.xlu0 %v5317_v1  ;;  %v163_v6 = vld [vmem:[#allocation2 + $0x38] sm:$0xff]  ;;  %v164_v7 = vld [vmem:[#allocation2 + $0x40] sm:$0xff]  ;;  %v54_v10 = vld [vmem:[%s5884_s0 + $0x8] sm:$0xff]  ;;  %vm5319_vm0 = vmmov 0   ;;  %v5320_v14 = vmov 0.0   ;;  %vm167_vm1 = vcmask 195584  }
  0x15   :  { %4981 = vmatprep.subr.bf16.mxu1 %v5318_v2  ;;  %v5356_v3 = vshrl.u32 %v29_v0, 7  ;;  %158 = vperm.xlu1 %5161, %v55_v4   ;;  %v68_v8 = vld [vmem:[#allocation2] sm:$0xff]  ;;  %v4982_v11 = vpack.c.bf16 %v164_v7, %v163_v6  ;;  %v69_v12 = vld [vmem:[#allocation2 + $0x8] sm:$0xff]  ;;  %v70_v13 = vld [vmem:[#allocation2 + $0x10] sm:$0xff]  ;;  %v5391_v32 = vand.u32 127, %v29_v0  ;;  %vm75_vm6 = vcmask 457728  }
  0x16   :  { %57 = vperm.xlu0 %5160, %v53_v5   ;;  %4592 = vmatprep.mubr.msk.f32.mxu1 %vm5319_vm0, %v5320_v14  ;;  %v4969_v15 = vpack.c.bf16 %v69_v12, %v68_v8  ;;  %v71_v16 = vld [vmem:[#allocation2 + $0x18] sm:$0xff]  ;;  %v72_v18 = vld [vmem:[#allocation2 + $0x20] sm:$0xff]  ;;  %v73_v19 = vld [vmem:[#allocation2 + $0x28] sm:$0xff]  ;;  %vm379_vm13 = vcmask 261120   ;;  %vm365_vm14 = vcmask 130048  }
  0x17   :  { %v5365_v9 = vadd.s32 8, %v5356_v3  ;;  %4983 = vmatpush3.bf16.msra.mxu1 %v4982_v11  ;;  %v4973_v17 = vpack.c.bf16 %v71_v16, %v70_v13  ;;  %v4299_v20 = vld [vmem:[%s5885_s1] ss:$0 sm:$0xff]  ;;  %v165_v21 = vld [vmem:[#allocation2 + $0x48] sm:$0xff]  ;;  %vm5382_vm4 = vmpackc.low %vm167_vm1, %vm167_vm1  ;;  %v4977_v25 = vpack.c.bf16 %v73_v19, %v72_v18  ;;  %vm353_vm12 = vcmp.eq.s32.totalorder %v5356_v3, %v5391_v32 }
  0x18   :  { %4970 = vmatprep.subr.bf16.mxu0 %v4969_v15  ;;  %vm250_vm2 = vcmp.eq.s32.totalorder %v4299_v20, %v5356_v3  ;;  %4590 = vmatprep.subr.mxu1 %v5320_v14  ;;  %v74_v27 = vld [vmem:[#allocation2 + $0x30] sm:$0xff]  ;;  %v374_v28 = vld [vmem:[#allocation2 + $0xb8] sm:$0xff]  ;;  %v375_v29 = vld [vmem:[#allocation2 + $0xc0] sm:$0xff]  ;;  %v4309_v47 = vsel %vm353_vm12, 1.0, %v5320_v14  ;;  %vm1807_vm12 = vcmask 64512  }
  0x19   :  { %vm251_vm3 = vcmp.eq.s32.totalorder %v4299_v20, %v5365_v9  ;;  %4972 = vmatpush3.bf16.msra.mxu0 %v4969_v15  ;;  %v4300_v22 = vsel %vm250_vm2, 1.0, %v5320_v14  ;;  %v4990_v30 = vpack.c.bf16 %v375_v29, %v374_v28  ;;  %v4302_v31 = vld [vmem:[%s5885_s1 + $0x1] ss:$0 sm:$0xff]  ;;  %v376_v38 = vld [vmem:[#allocation2 + $0xc8] sm:$0xff]  ;;  %v377_v39 = vld [vmem:[#allocation2 + $0xd0] sm:$0xff]  ;;  %vm354_vm11 = vcmp.eq.s32.totalorder %v5365_v9, %v5391_v32  ;;  %s5322_s1 = smov [#allocation5]  }
  0x1a   :  { %60 = vperm.xlu0 %5160, %v54_v10   ;;  %v4301_v23 = vsel %vm251_vm3, 1.0, %v5320_v14  ;;  %4974 = vmatprep.subr.bf16.mxu0 %v4973_v17  ;;  %vm260_vm5 = vcmp.eq.s32.totalorder %v4302_v31, %v5356_v3  ;;  %vm261_vm10 = vcmp.eq.s32.totalorder %v4302_v31, %v5365_v9  ;;  %v4994_v41 = vpack.c.bf16 %v377_v39, %v376_v38  ;;  %v5433_v60 = vld [vmem:[#allocation2 + $0x100] sm:$0x7]  ;;  %v5436_v61 = vld [vmem:[#allocation2 + $0x128] sm:$0x7]  ;;  %vm5458_vm15 = vmpackc.low %vm379_vm13, %vm379_vm13  ;;  %s4280_s7 = sshll.u32 %s5322_s1, 4  ;;  %s4281_s7 = int_to_ptr.vmem [resolvable:$true] %s4280_s7 }
  0x1b   :  { %v4984_v26 = vpack.c.bf16 %v4301_v23, %v4300_v22  ;;  %4591 = vmatpush3.msra.mxu1 %v165_v21  ;;  %v4303_v35 = vsel %vm260_vm5, 1.0, %v5320_v14  ;;  %v4304_v43 = vsel %vm261_vm10, 1.0, %v5320_v14  ;;  %v4310_v46 = vsel %vm354_vm11, 1.0, %v5320_v14  ;;  %v378_v62 = vld [vmem:[#allocation2 + $0xd8] sm:$0x7]  ;;  %v727_v24 = vld [vmem:[#allocation2 + $0xe0] sm:$0xff]  ;;  %p5293_p9 = scmp.lt.s32.totalorder %s4281_s7, %s4281_s7 }
  0x1c   :  { %v360_v50 = vsub.f32 1.0, %v4310_v46  ;;  %v359_v51 = vsub.f32 1.0, %v4309_v47  ;;  %v5451_v10 = vsub.s32 0, %v5356_v3  ;;  %v558_v23 = vrot.slane %v378_v62, 1  ;;  %v166_v21 = vld [vmem:[#allocation2 + $0x50] sm:$0xff]  ;;  %s5288_s8 = scalar_lea.vmem %s4281_s7, 16 }
  0x1d   :  { %4986 = vmatprep.subr.msk.bf16.mxu1 %vm5382_vm4, %v4984_v26  ;;  %4976 = vmatpush3.bf16.msra.mxu0 %v4973_v17  ;;  %vm36_vm2 = vcmp.ge.s32.totalorder %v5391_v32, 8  ;;  %vm37_vm3 = vcmp.lt.s32.totalorder %v5391_v32, 16  ;;  %vm47_vm10 = vcmp.lt.s32.totalorder %v5391_v32, 32  ;;  %p5289_p8 = scmp.ne.s32.totalorder %s4281_s7, %s5288_s8  ;;  %s5292_s9 = scalar_lea.vmem %s4281_s7, 32 }
  0x1e   :  { %4978 = vmatprep.subr.bf16.mxu0 %v4977_v25  ;;  %v549_v11 = vrot.slane %v378_v62, %v5451_v10  ;;  %vm38_vm5 = vmand %vm36_vm2, %vm37_vm3  ;;  %vm4018_vm2 = vcmask 57344   ;;  %vm4261_vm3 = vcmask 8192   ;;  %p5294_p10 = scmp.lt.s32.totalorder %s5292_s9, %s5288_s8 }
  0x20   :  { %p5295_p11 = por %p5294_p10, %p5293_p9 }
  0x21   :  { %4980 = vmatpush3.bf16.msra.mxu0 %v4977_v25  ;;  %v728_v25 = vld [vmem:[#allocation2 + $0xe8] sm:$0xff] }
  0x22   :  { %4581 = vmatprep.subr.mxu0 %v74_v27  ;;  %p5296_p12 = pnand %p5295_p11, %p5289_p8 }
  0x25   :  { %4582 = vmatpush3.msra.mxu0 %v74_v27 }
  0x26   :  { %4991 = vmatprep.subr.bf16.mxu0 %v4990_v30 }
  0x94   :  { %v159_v33 = vpop.permute.xlu1 %158 }
  0x95   :  { %v58_v34 = vpop.permute.xlu0 %57  ;;  %vm160_vm7 = vcmp.eq.s32.totalorder %v159_v33, %v5391_v32 }
  0x96   :  { %vm62_vm8 = vcmp.eq.s32.totalorder %v58_v34, %v5391_v32  ;;  %v4297_v36 = vsel %vm160_vm7, 1.0, %v5320_v14  ;;  %vm42_vm7 = vcmp.lt.s32.totalorder %v5391_v32, 24 }
  0x97   :  { %v4293_v37 = vsel %vm62_vm8, 1.0, %v5320_v14  ;;  %4593 = vmatmul.mubr.msk.f32.vlgmr.msra.gmra.mrb[0].mxu1 %vm167_vm1, %v4297_v36  ;;  %v5321_v36 = vmov -1e+30  }
  0x98   :  { %4583 = vmatprep.mubr.msk.f32.mxu0 %vm75_vm6, %v4293_v37  ;;  %4989 = vmatpush3.bf16.xpose.msk.msra.mxu1 %vm5382_vm4, %v4984_v26  ;;  %v5009_v26 = vpack.c.bf16 %v728_v25, %v727_v24  ;;  %v1069_v24 = vld [vmem:[#allocation2 + $0x120] sm:$0xff]  ;;  %vm32_vm4 = vcmp.lt.s32.totalorder %v5391_v32, 8 }
  0x99   :  { %v61_v40 = vpop.permute.xlu0 %60  ;;  %4599 = vmatprep.mubr.msk.f32.mxu1 %vm167_vm1, %v4303_v35 }
  0x9a   :  { %vm63_vm9 = vcmp.eq.s32.totalorder %v61_v40, %v5391_v32 }
  0x9b   :  { %v4294_v42 = vsel %vm63_vm9, 1.0, %v5320_v14  ;;  %vm46_vm9 = vcmp.ge.s32.totalorder %v5391_v32, 24 }
  0x9c   :  { %4584 = vmatmul.mubr.msk.f32.vlgmr.msra.gmra.mrb[0].mxu0 %vm75_vm6, %v4294_v42  ;;  %v730_v42 = vld [vmem:[#allocation2 + $0xf8] sm:$0xff]  ;;  %vm41_vm6 = vcmp.ge.s32.totalorder %v5391_v32, 16  ;;  %vm48_vm11 = vmand %vm46_vm9, %vm47_vm10 }
  0x9d   :  { %4993 = vmatpush3.bf16.msra.mxu0 %v4990_v30  ;;  %vm43_vm8 = vmand %vm41_vm6, %vm42_vm7 }
  0x9e   :  { %4995 = vmatprep.subr.bf16.mxu0 %v4994_v41 }
  0x9f   :  { %4600 = vmatmul.mubr.msk.f32.vlgmr.msra.gmra.mrb[2].mxu1 %vm167_vm1, %v4304_v43  ;;  %vm51_vm1 = vcmp.lt.s32.totalorder %v5391_v32, 10 }
  0xa0   :  { %v5468_v37 = vsel %vm51_vm1, 0.0, %v5321_v36  ;;  %vm1407_vm1 = vcmask 253952  }
  0xa1   :  { %4997 = vmatpush3.bf16.msra.mxu0 %v4994_v41  ;;  %v729_v41 = vld [vmem:[#allocation2 + $0xf0] sm:$0xff] }
  0xa2   :  { %5006 = vmatprep.subr.bf16.mxu0 %v5318_v2  ;;  %v5013_v43 = vpack.c.bf16 %v730_v42, %v729_v41 }
 0x16a   :  { %v5413_v44 = vpop.f32.mrb[0].mxu1 }
 0x16b   :  { %v4594_v45 = vpop.f32.mrb[1].mxu1 }
 0x16f   :  { %v4585_v48 = vpop.f32.mrb[0].mxu0 }
 0x170   :  { %v148_v49 = vpop.f32.mrb[1].mxu0 }
 0x171   :  { %4610 = vmatprep.mubr.msk.f32.mxu0 %vm379_vm13, %v148_v49 }
 0x172   :  { %4611 = vmatmul.mubr.msk.f32.vlgmr.msra.gmra.mrb[2].mxu0 %vm379_vm13, %v4585_v48  ;;  %v4601_v52 = vpop.f32.mrb[2].mxu1 }
 0x173   :  { %4631 = vmatprep.mubr.msk.f32.mxu0 %vm5319_vm0, %v5320_v14  ;;  %v362_v53 = vmul.f32 %v4601_v52, %v360_v50  ;;  %v344_v54 = vpop.f32.mrb[3].mxu1 }
 0x174   :  { %v361_v55 = vmul.f32 %v359_v51, %v344_v54 }
 0x175   :  { %v5423_v56 = vadd.f32 %v4310_v46, %v362_v53  ;;  %v889_v53 = vrot.slane %v5433_v60, %v5451_v10 }
 0x176   :  { %v5425_v57 = vadd.f32 %v4309_v47, %v361_v55 }
 0x177   :  { %v369_v58 = vsel %vm365_vm14, %v5423_v56, 0.0 }
 0x178   :  { %370 = vadd.xlane.f32.xlu0 %v369_v58  ;;  %v366_v59 = vsel %vm365_vm14, %v5425_v57, 0.0  ;;  %4617 = vmatprep.mubr.msk.f32.mxu1 %vm365_vm14, %v5425_v57 }
 0x179   :  { %367 = vadd.xlane.f32.xlu1 %v366_v59 }
 0x18a   :  { %896 = vperm.xlu1 %5161, %v5433_v60  }
 0x18e   :  { %1235 = vperm.xlu1 %5161, %v5436_v61   ;;  %556 = vperm.xlu0 %5160, %v378_v62  }
 0x205   :  { %v371_v63 = vpop.xlane.xlu0 %370 }
 0x206   :  { %v368_v0 = vpop.xlane.xlu1 %367  ;;  %5162 = vrsqrt.f32 %v371_v63 }
 0x207   :  { %5164 = vrsqrt.f32 %v368_v0 }
 0x20d   :  { %v557_v27 = vpop.permute.xlu0 %556 }
 0x20e   :  { %v559_v28 = vrot.slane %v557_v27, 2 }
 0x210   :  { %v5439_v1 = vpop.eup %5162 }
 0x211   :  { %v5441_v4 = vpop.eup %5164 }
 0x245   :  { %v4612_v5 = vpop.f32.mrb[2].mxu0 }
 0x246   :  { %v462_v6 = vmul.f32 %v5439_v1, %v4612_v5  ;;  %v452_v7 = vpop.f32.mrb[3].mxu0 }
 0x247   :  { %v461_v8 = vmul.f32 %v5441_v4, %v452_v7  ;;  %v898_v7 = vrot.slane %v5433_v60, 1 }
 0x249   :  { %v4998_v9 = vpack.c.bf16 %v462_v6, %v461_v8  ;;  %v1066_v8 = vld [vmem:[#allocation2 + $0x108] sm:$0xff] }
 0x24b   :  { %4999 = vmatprep.subr.bf16.mxu1 %v4998_v9 }
 0x24c   :  { %5001 = vmatpush3.bf16.msra.mxu1 %v4998_v9  ;;  %v1067_v9 = vld [vmem:[#allocation2 + $0x110] sm:$0xff] }
 0x24d   :  { %5002 = vmatprep.subr.bf16.mxu1 %v5318_v2 }
 0x24f   :  { %4618 = vmatmul.mubr.msk.f32.vlgmr.msra.gmra.mrb[4].mxu1 %vm365_vm14, %v5423_v56 }
 0x250   :  { %4624 = vmatprep.mubr.msk.f32.mxu1 %vm5319_vm0, %v5320_v14 }
 0x322   :  { %v4619_v12 = vpop.f32.mrb[4].mxu1 }
 0x323   :  { %v545_v13 = vmul.f32 %v5439_v1, %v4619_v12  ;;  %v535_v15 = vpop.f32.mrb[5].mxu1  ;;  %v897_v12 = vpop.permute.xlu1 %896 }
 0x324   :  { %v544_v16 = vmul.f32 %v5441_v4, %v535_v15 }
 0x325   :  { %v551_v17 = vadd.f32 %v549_v11, %v545_v13  ;;  %v899_v13 = vrot.slane %v897_v12, 2 }
 0x326   :  { %v550_v18 = vadd.f32 %v549_v11, %v544_v16  ;;  %v5028_v11 = vpack.c.bf16 %v1067_v9, %v1066_v8 }
 0x327   :  { %v553_v19 = vmax.f32 %v551_v17, 0.0 }
 0x328   :  { %v552_v20 = vmax.f32 %v550_v18, 0.0 }
 0x32a   :  { %v5003_v22 = vpack.c.bf16 %v553_v19, %v552_v20 }
 0x32c   :  { %5005 = vmatpush3.bf16.xpose.msk.msra.mxu1 %vm5458_vm15, %v5003_v22  ;;  %5008 = vmatpush3.bf16.msra.mxu0 %v5003_v22 }
 0x32d   :  { %5010 = vmatprep.subr.bf16.mxu0 %v5009_v26 }
 0x333   :  { %4625 = vmatmul.mubr.msk.f32.vlgmr.msra.gmra.mrb[6].mxu1 %vm379_vm13, %v558_v23 }
 0x334   :  { %4649 = vmatprep.mubr.msk.f32.mxu1 %vm365_vm14, %v5425_v57 }
 0x406   :  { %v635_v29 = vpop.f32.mrb[6].mxu1 }
 0x407   :  { %v636_v30 = vadd.f32 %v635_v29, %v559_v28  ;;  %v4626_v31 = vpop.f32.mrb[7].mxu1 }
 0x409   :  { %v4318_v33 = vmul.f32 -1.442695, %v636_v30 }
 0x40b   :  { %5166 = vpow2.f32 %v4318_v33 }
 0x415   :  { %v5167_v34 = vpop.eup %5166 }
 0x416   :  { %v642_v35 = vadd.f32 1.0, %v5167_v34 }
 0x418   :  { %5168 = vrcp.f32 %v642_v35  ;;  %v1228_v35 = vrot.slane %v5436_v61, %v5451_v10 }
 0x422   :  { %v5169_v38 = vpop.eup %5168 }
 0x423   :  { %v645_v39 = vadd.f32 %v5169_v38, %v5468_v37 }
 0x425   :  { %v646_v40 = vmul.f32 1.442695, %v645_v39 }
 0x427   :  { %5170 = vpow2.f32 %v646_v40 }
 0x431   :  { %v5471_v45 = vpop.eup %5170 }
 0x432   :  { %4632 = vmatmul.mubr.msk.f32.vlgmr.msra.gmra.mrb[4].mxu0 %vm365_vm14, %v5471_v45 }
 0x433   :  { %5012 = vmatpush3.bf16.msra.mxu0 %v5009_v26  ;;  %4642 = vmatprep.mubr.msk.f32.mxu0 %vm379_vm13, %v552_v20 }
 0x434   :  { %5014 = vmatprep.subr.bf16.mxu0 %v5013_v43 }
 0x437   :  { %5016 = vmatpush3.bf16.msra.mxu0 %v5013_v43 }
 0x438   :  { %5025 = vmatprep.subr.bf16.mxu0 %v5318_v2 }
 0x43a   :  { %4643 = vmatmul.mubr.msk.f32.vlgmr.msra.gmra.mrb[6].mxu0 %vm379_vm13, %v553_v19 }
 0x43b   :  { %4663 = vmatprep.mubr.msk.f32.mxu0 %vm5319_vm0, %v5320_v14 }
 0x505   :  { %v5480_v46 = vpop.f32.mrb[4].mxu0 }
 0x506   :  { %v4633_v47 = vpop.f32.mrb[5].mxu0 }
 0x50d   :  { %v4644_v48 = vpop.f32.mrb[6].mxu0 }
 0x50e   :  { %v808_v49 = vmul.f32 %v5439_v1, %v4644_v48  ;;  %v798_v50 = vpop.f32.mrb[7].mxu0 }
 0x50f   :  { %v807_v51 = vmul.f32 %v5441_v4, %v798_v50 }
 0x511   :  { %v5017_v52 = vpack.c.bf16 %v808_v49, %v807_v51  ;;  %v1480_v49 = vld [vmem:[#allocation2 + $0x158] sm:$0xff]  ;;  %v1481_v51 = vld [vmem:[#allocation2 + $0x160] sm:$0xff] }
 0x513   :  { %5018 = vmatprep.subr.bf16.mxu1 %v5017_v52 }
 0x514   :  { %5020 = vmatpush3.bf16.msra.mxu1 %v5017_v52 }
 0x515   :  { %5021 = vmatprep.subr.bf16.mxu1 %v5318_v2 }
 0x517   :  { %4650 = vmatmul.mubr.msk.f32.vlgmr.msra.gmra.mrb[8].mxu1 %vm365_vm14, %v5423_v56 }
 0x518   :  { %4656 = vmatprep.mubr.msk.f32.mxu1 %vm5319_vm0, %v5320_v14 }
 0x5ea   :  { %v4651_v54 = vpop.f32.mrb[8].mxu1 }
 0x5eb   :  { %v885_v55 = vmul.f32 %v5439_v1, %v4651_v54  ;;  %v875_v58 = vpop.f32.mrb[9].mxu1 }
 0x5ec   :  { %v884_v59 = vmul.f32 %v5441_v4, %v875_v58 }
 0x5ed   :  { %v891_v62 = vadd.f32 %v889_v53, %v885_v55 }
 0x5ee   :  { %v890_v63 = vadd.f32 %v889_v53, %v884_v59  ;;  %v5532_v53 = vadd.f32 %v5413_v44, %v166_v21 }
 0x5ef   :  { %v893_v0 = vmax.f32 %v891_v62, 0.0  ;;  %v5540_v62 = vsub.s32 1, %v5356_v3 }
 0x5f0   :  { %v892_v5 = vmax.f32 %v890_v63, 0.0  ;;  %v5542_v63 = vld [vmem:[#allocation2 + $0x210] sm:$0xff] }
 0x5f2   :  { %v5022_v6 = vpack.c.bf16 %v893_v0, %v892_v5 }
 0x5f4   :  { %5024 = vmatpush3.bf16.xpose.msk.msra.mxu1 %vm5458_vm15, %v5022_v6  ;;  %5027 = vmatpush3.bf16.msra.mxu0 %v5022_v6 }
 0x5f5   :  { %5029 = vmatprep.subr.bf16.mxu0 %v5028_v11 }
 0x5fb   :  { %4657 = vmatmul.mubr.msk.f32.vlgmr.msra.gmra.mrb[10].mxu1 %vm379_vm13, %v898_v7 }
 0x5fc   :  { %4681 = vmatprep.mubr.msk.f32.mxu1 %vm365_vm14, %v5425_v57  ;;  %v1068_v57 = vld [vmem:[#allocation2 + $0x118] sm:$0xff] }
 0x5fd   :  { %v5032_v25 = vpack.c.bf16 %v1069_v24, %v1068_v57  ;;  %v1485_v57 = vld [vmem:[#allocation2 + $0x180] sm:$0xff]  ;;  %v1486_v24 = vld [vmem:[#allocation2 + $0x188] sm:$0xff] }
 0x6ce   :  { %v975_v15 = vpop.f32.mrb[10].mxu1 }
 0x6cf   :  { %v976_v16 = vadd.f32 %v975_v15, %v899_v13  ;;  %v4658_v17 = vpop.f32.mrb[11].mxu1  ;;  %v1475_v15 = vld [vmem:[#allocation2 + $0x130] sm:$0xff] }
 0x6d1   :  { %v4327_v18 = vmul.f32 -1.442695, %v976_v16  ;;  %v1476_v16 = vld [vmem:[#allocation2 + $0x138] sm:$0xff] }
 0x6d2   :  { %v5048_v17 = vpack.c.bf16 %v1476_v16, %v1475_v15 }
 0x6d3   :  { %5172 = vpow2.f32 %v4327_v18  ;;  %v1477_v18 = vld [vmem:[#allocation2 + $0x140] sm:$0xff] }
 0x6dd   :  { %v5173_v19 = vpop.eup %5172 }
 0x6de   :  { %v982_v20 = vadd.f32 1.0, %v5173_v19  ;;  %v1478_v19 = vld [vmem:[#allocation2 + $0x148] sm:$0xff] }
 0x6e0   :  { %5174 = vrcp.f32 %v982_v20 }
 0x6ea   :  { %v5175_v60 = vpop.eup %5174 }
 0x6eb   :  { %v985_v22 = vadd.f32 %v5175_v60, %v5468_v37  ;;  %v5051_v60 = vpack.c.bf16 %v1478_v19, %v1477_v18 }
 0x6ed   :  { %v986_v23 = vmul.f32 1.442695, %v985_v22  ;;  %v1484_v22 = vld [vmem:[#allocation2 + $0x178] sm:$0xff] }
 0x6ef   :  { %5176 = vpow2.f32 %v986_v23 }
 0x6f9   :  { %v5500_v26 = vpop.eup %5176 }
 0x6fa   :  { %4664 = vmatmul.mubr.msk.f32.vlgmr.msra.gmra.mrb[8].mxu0 %vm365_vm14, %v5500_v26 }
 0x6fb   :  { %5031 = vmatpush3.bf16.msra.mxu0 %v5028_v11  ;;  %4674 = vmatprep.mubr.msk.f32.mxu0 %vm379_vm13, %v892_v5 }
 0x6fc   :  { %5033 = vmatprep.subr.bf16.mxu0 %v5032_v25 }
 0x6ff   :  { %5035 = vmatpush3.bf16.msra.mxu0 %v5032_v25  ;;  %v5063_v25 = vpack.c.bf16 %v1486_v24, %v1485_v57 }
 0x700   :  { %5044 = vmatprep.subr.bf16.mxu0 %v5318_v2 }
 0x702   :  { %4675 = vmatmul.mubr.msk.f32.vlgmr.msra.gmra.mrb[10].mxu0 %vm379_vm13, %v893_v0  ;;  %v1585_v0 = vrot.slane %v5542_v63, %v5540_v62 }
 0x703   :  { %4695 = vmatprep.mubr.msk.f32.mxu0 %vm5319_vm0, %v5320_v14 }
 0x7cd   :  { %v5509_v27 = vpop.f32.mrb[8].mxu0 }
 0x7ce   :  { %v4665_v28 = vpop.f32.mrb[9].mxu0 }
 0x7d5   :  { %v4676_v29 = vpop.f32.mrb[10].mxu0 }
 0x7d6   :  { %v1147_v30 = vmul.f32 %v5439_v1, %v4676_v29  ;;  %v1137_v31 = vpop.f32.mrb[11].mxu0 }
 0x7d7   :  { %v1146_v33 = vmul.f32 %v5441_v4, %v1137_v31  ;;  %v5583_v31 = vsel %vm32_vm4, 1.0, %v5320_v14 }
 0x7d9   :  { %v5036_v34 = vpack.c.bf16 %v1147_v30, %v1146_v33  ;;  %v1508_v30 = vrot.slane %v5542_v63, %v5451_v10  ;;  %v5586_v33 = vsel %vm38_vm5, 1.0, %v5320_v14 }
 0x7db   :  { %5037 = vmatprep.subr.bf16.mxu1 %v5036_v34 }
 0x7dc   :  { %5039 = vmatpush3.bf16.msra.mxu1 %v5036_v34 }
 0x7dd   :  { %5040 = vmatprep.subr.bf16.mxu1 %v5318_v2 }
 0x7df   :  { %4682 = vmatmul.mubr.msk.f32.vlgmr.msra.gmra.mrb[12].mxu1 %vm365_vm14, %v5423_v56  ;;  %v1479_v56 = vld [vmem:[#allocation2 + $0x150] sm:$0xff] }
 0x7e0   :  { %4688 = vmatprep.mubr.msk.f32.mxu1 %vm5319_vm0, %v5320_v14  ;;  %v5054_v50 = vpack.c.bf16 %v1480_v49, %v1479_v56 }
 0x8b2   :  { %v4683_v36 = vpop.f32.mrb[12].mxu1 }
 0x8b3   :  { %v1224_v38 = vmul.f32 %v5439_v1, %v4683_v36  ;;  %v1214_v39 = vpop.f32.mrb[13].mxu1  ;;  %v1237_v1 = vrot.slane %v5436_v61, 1  ;;  %v1236_v61 = vpop.permute.xlu1 %1235 }
 0x8b4   :  { %v1223_v40 = vmul.f32 %v5441_v4, %v1214_v39  ;;  %v1482_v4 = vld [vmem:[#allocation2 + $0x168] sm:$0xff]  ;;  %v1238_v54 = vrot.slane %v1236_v61, 2 }
 0x8b5   :  { %v1230_v41 = vadd.f32 %v1228_v35, %v1224_v38  ;;  %v5057_v52 = vpack.c.bf16 %v1482_v4, %v1481_v51  ;;  %v1658_v38 = vsub.s32 2, %v5356_v3 }
 0x8b6   :  { %v1229_v42 = vadd.f32 %v1228_v35, %v1223_v40 }
 0x8b7   :  { %v1232_v43 = vmax.f32 %v1230_v41, 0.0  ;;  %v5594_v41 = vsel %vm43_vm8, 1.0, %v5320_v14 }
 0x8b8   :  { %v1231_v47 = vmax.f32 %v1229_v42, 0.0  ;;  %v1659_v42 = vrot.slane %v5542_v63, %v1658_v38 }
 0x8ba   :  { %v5041_v48 = vpack.c.bf16 %v1232_v43, %v1231_v47  ;;  %v5610_v43 = vsel %vm48_vm11, 1.0, %v5320_v14 }
 0x8bc   :  { %5043 = vmatpush3.bf16.xpose.msk.msra.mxu1 %vm5458_vm15, %v5041_v48  ;;  %5046 = vmatpush3.bf16.msra.mxu0 %v5041_v48  ;;  %vm721_vm15 = vcmask 122880  }
 0x8bd   :  { %5053 = vmatprep.subr.bf16.mxu1 %v5318_v2  ;;  %5047 = vmatprep.subr.bf16.mxu0 %v5318_v2 }
 0x8c3   :  { %4689 = vmatmul.mubr.msk.f32.vlgmr.msra.gmra.mrb[14].mxu1 %vm379_vm13, %v1237_v1 }
 0x8c4   :  { %5055 = vmatpush3.bf16.msra.mxu1 %v5054_v50  ;;  %4717 = vmatprep.mubr.msk.f32.mxu1 %vm5319_vm0, %v5320_v14 }
 0x8c5   :  { %5056 = vmatprep.subr.bf16.mxu1 %v5318_v2 }
 0x8c8   :  { %5058 = vmatpush3.bf16.msra.mxu1 %v5057_v52 }
 0x8c9   :  { %4731 = vmatprep.subr.mxu1 %v5320_v14 }
 0x8cb   :  { %4718 = vmatmul.mubr.msk.f32.vlgmr.msra.gmra.mrb[16].mxu1 %vm379_vm13, %v5532_v53 }
 0x8cc   :  { %4733 = vmatprep.mubr.msk.f32.mxu1 %vm5319_vm0, %v5320_v14 }
 0x996   :  { %v1314_v55 = vpop.f32.mrb[14].mxu1 }
 0x997   :  { %v1315_v58 = vadd.f32 %v1314_v55, %v1238_v54  ;;  %v4690_v59 = vpop.f32.mrb[15].mxu1 }
 0x999   :  { %v4336_v44 = vmul.f32 -1.442695, %v1315_v58 }
 0x99b   :  { %5178 = vpow2.f32 %v4336_v44 }
 0x99e   :  { %v1652_v5 = vpop.f32.mrb[16].mxu1 }
 0x99f   :  { %v5546_v6 = vadd.f32 %v1652_v5, %v1585_v0  ;;  %v4719_v7 = vpop.f32.mrb[17].mxu1 }
 0x9a1   :  { %4732 = vmatpush3.xpose.msk.msra.mxu1 %vm379_vm13, %v5546_v6 }
 0x9a2   :  { %4736 = vmatprep.subr.mxu1 %v5320_v14 }
 0x9a5   :  { %v5179_v8 = vpop.eup %5178 }
 0x9a6   :  { %v1321_v9 = vadd.f32 1.0, %v5179_v8 }
 0x9a8   :  { %5180 = vrcp.f32 %v1321_v9 }
 0x9b2   :  { %v5181_v11 = vpop.eup %5180 }
 0x9b3   :  { %v1324_v12 = vadd.f32 %v5181_v11, %v5468_v37  ;;  %v1483_v37 = vld [vmem:[#allocation2 + $0x170] sm:$0xff] }
 0x9b4   :  { %v5060_v23 = vpack.c.bf16 %v1484_v22, %v1483_v37 }
 0x9b5   :  { %v1325_v13 = vmul.f32 1.442695, %v1324_v12 }
 0x9b7   :  { %5182 = vpow2.f32 %v1325_v13 }
 0x9c1   :  { %v5552_v20 = vpop.eup %5182 }
 0x9c2   :  { %4696 = vmatmul.mubr.msk.f32.vlgmr.msra.gmra.mrb[12].mxu0 %vm365_vm14, %v5552_v20  ;;  %vm2557_vm14 = vcmask 523264  }
 0x9c3   :  { %5049 = vmatpush3.bf16.msra.mxu0 %v5048_v17  ;;  %4706 = vmatprep.mubr.msk.f32.mxu0 %vm5319_vm0, %v5320_v14 }
 0x9c4   :  { %5050 = vmatprep.subr.bf16.mxu0 %v5318_v2 }
 0x9c7   :  { %5052 = vmatpush3.bf16.msra.mxu0 %v5051_v60 }
 0x9c8   :  { %5059 = vmatprep.subr.bf16.mxu0 %v5318_v2 }
 0x9ca   :  { %4707 = vmatmul.mubr.msk.f32.vlgmr.msra.gmra.mrb[14].mxu0 %vm379_vm13, %v5532_v53 }
 0x9cb   :  { %5061 = vmatpush3.bf16.msra.mxu0 %v5060_v23  ;;  %4728 = vmatprep.mubr.msk.f32.mxu0 %vm5319_vm0, %v5320_v14 }
 0x9cc   :  { %5062 = vmatprep.subr.bf16.mxu0 %v5318_v2 }
 0x9cf   :  { %5064 = vmatpush3.bf16.msra.mxu0 %v5063_v25 }
 0x9d0   :  { %4741 = vmatprep.subr.mxu0 %v5320_v14 }
 0x9d2   :  { %4729 = vmatmul.mubr.msk.f32.vlgmr.msra.gmra.mrb[16].mxu0 %vm379_vm13, %v5532_v53 }
 0x9d3   :  { %4743 = vmatprep.mubr.msk.f32.mxu0 %vm5319_vm0, %v5320_v14 }
 0x9d8   :  { %4742 = vmatpush3.xpose.msk.msra.mxu0 %vm379_vm13, %v5546_v6 }
 0x9d9   :  { %4751 = vmatprep.subr.mxu0 %v5320_v14 }
 0xa95   :  { %v5573_v28 = vpop.f32.mrb[12].mxu0 }
 0xa96   :  { %v4697_v29 = vpop.f32.mrb[13].mxu0 }
 0xa9d   :  { %v1578_v34 = vpop.f32.mrb[14].mxu0 }
 0xa9e   :  { %v1579_v35 = vadd.f32 %v1578_v34, %v1508_v30  ;;  %v4708_v36 = vpop.f32.mrb[15].mxu0 }
 0xaa0   :  { %v1730_v39 = vmul.f32 %v5583_v31, %v1579_v35  ;;  %v1893_v40 = vmul.f32 %v5586_v33, %v1579_v35  ;;  %v2053_v32 = vmul.f32 %v5594_v41, %v1579_v35  ;;  %v2213_v49 = vmul.f32 %v5610_v43, %v1579_v35 }
 0xaa2   :  { %4734 = vmatmul.mubr.msk.f32.vlgmr.msra.gmra.mrb[18].mxu1 %vm379_vm13, %v1730_v39  ;;  %4744 = vmatmul.mubr.msk.f32.vlgmr.msra.gmra.mrb[18].mxu0 %vm379_vm13, %v1893_v40 }
 0xaa3   :  { %4752 = vmatpush3.xpose.msk.msra.mxu0 %vm379_vm13, %v5546_v6  ;;  %4753 = vmatprep.mubr.msk.f32.mxu0 %vm5319_vm0, %v5320_v14 }
 0xaa4   :  { %4761 = vmatprep.subr.mxu0 %v5320_v14  ;;  %4738 = vmatprep.mubr.msk.f32.mxu1 %vm5319_vm0, %v5320_v14 }
 0xaa5   :  { %v1726_v47 = vpop.f32.mrb[16].mxu0 }
 0xaa6   :  { %v5612_v48 = vadd.f32 %v1726_v47, %v1659_v42  ;;  %v4730_v56 = vpop.f32.mrb[17].mxu0  ;;  %4754 = vmatmul.mubr.msk.f32.vlgmr.msra.gmra.mrb[20].mxu0 %vm379_vm13, %v2053_v32 }
 0xaa7   :  { %4762 = vmatpush3.xpose.msk.msra.mxu0 %vm379_vm13, %v5546_v6  ;;  %4763 = vmatprep.mubr.msk.f32.mxu0 %vm5319_vm0, %v5320_v14 }
 0xaa8   :  { %4737 = vmatpush3.msra.mxu1 %v5612_v48  ;;  %5065 = vmatprep.subr.bf16.mxu0 %v5318_v2 }
 0xaa9   :  { %4746 = vmatprep.subr.mxu1 %v5320_v14 }
 0xaaa   :  { %4764 = vmatmul.mubr.msk.f32.vlgmr.msra.gmra.mrb[22].mxu0 %vm379_vm13, %v2213_v49  ;;  %v1487_v49 = vld [vmem:[#allocation2 + $0x190] sm:$0xff] }
 0xaab   :  { %4779 = vmatprep.mubr.msk.f32.mxu0 %vm5319_vm0, %v5320_v14 }
 0xb75   :  { %v1803_v1 = vpop.f32.mrb[18].mxu1  ;;  %v1963_v50 = vpop.f32.mrb[18].mxu0 }
 0xb76   :  { %v4735_v51 = vpop.f32.mrb[19].mxu1  ;;  %v4745_v4 = vpop.f32.mrb[19].mxu0  ;;  %v1967_v52 = vsel %vm1807_vm12, %v1963_v50, -inf  ;;  %v1808_v21 = vsel %vm1807_vm12, %v1803_v1, -inf }
 0xb77   :  { %1968 = vmax.xlane.f32.xlu1 %v1967_v52  ;;  %1809 = vmax.xlane.f32.xlu0 %v1808_v21  ;;  %v1489_v51 = vld [vmem:[#allocation2 + $0x1a0] sm:$0xff]  ;;  %v1490_v4 = vld [vmem:[#allocation2 + $0x1a8] sm:$0xff] }
 0xb79   :  { %v2123_v61 = vpop.f32.mrb[20].mxu0 }
 0xb7a   :  { %v4755_v54 = vpop.f32.mrb[21].mxu0  ;;  %v2127_v55 = vsel %vm1807_vm12, %v2123_v61, -inf }
 0xb7b   :  { %2128 = vmax.xlane.f32.xlu0 %v2127_v55 }
 0xb7d   :  { %v2283_v58 = vpop.f32.mrb[22].mxu0 }
 0xb7e   :  { %v4765_v59 = vpop.f32.mrb[23].mxu0  ;;  %v2287_v44 = vsel %vm1807_vm12, %v2283_v58, -inf }
 0xb7f   :  { %2288 = vmax.xlane.f32.xlu0 %v2287_v44 }
 0xc04   :  { %v1969_v0 = vpop.xlane.xlu1 %1968  ;;  %v1810_v5 = vpop.xlane.xlu0 %1809 }
 0xc05   :  { %v1970_v6 = vsub.f32 %v1963_v50, %v1969_v0  ;;  %v1811_v7 = vsub.f32 %v1803_v1, %v1810_v5  ;;  %v1488_v1 = vld [vmem:[#allocation2 + $0x198] sm:$0xff] }
 0xc06   :  { %v5066_v50 = vpack.c.bf16 %v1488_v1, %v1487_v49 }
 0xc07   :  { %v1971_v8 = vmul.f32 1.442695, %v1970_v6  ;;  %v1812_v9 = vmul.f32 1.442695, %v1811_v7 }
 0xc08   :  { %v2129_v11 = vpop.xlane.xlu0 %2128  ;;  %5067 = vmatpush3.bf16.msra.mxu0 %v5066_v50 }
 0xc09   :  { %5184 = vpow2.f32 %v1971_v8  ;;  %v2130_v12 = vsub.f32 %v2123_v61, %v2129_v11  ;;  %5068 = vmatprep.subr.bf16.mxu0 %v5318_v2 }
 0xc0a   :  { %5186 = vpow2.f32 %v1812_v9 }
 0xc0b   :  { %v2131_v13 = vmul.f32 1.442695, %v2130_v12  ;;  %v2375_v12 = vsub.s32 3, %v5356_v3 }
 0xc0c   :  { %v2289_v15 = vpop.xlane.xlu0 %2288 }
 0xc0d   :  { %5188 = vpow2.f32 %v2131_v13  ;;  %v2290_v16 = vsub.f32 %v2283_v58, %v2289_v15  ;;  %v2376_v13 = vrot.slane %v5542_v63, %v2375_v12 }
 0xc0f   :  { %v2291_v17 = vmul.f32 1.442695, %v2290_v16 }
 0xc11   :  { %5190 = vpow2.f32 %v2291_v17 }
 0xc13   :  { %v5185_v18 = vpop.eup %5184 }
 0xc14   :  { %v5187_v19 = vpop.eup %5186  ;;  %v1973_v60 = vsel %vm1807_vm12, %v5185_v18, 0.0 }
 0xc15   :  { %1974 = vadd.xlane.f32.xlu0 %v1973_v60  ;;  %v1814_v37 = vsel %vm1807_vm12, %v5187_v19, 0.0 }
 0xc16   :  { %1815 = vadd.xlane.f32.xlu1 %v1814_v37 }
 0xc17   :  { %v5189_v22 = vpop.eup %5188 }
 0xc18   :  { %v2133_v23 = vsel %vm1807_vm12, %v5189_v22, 0.0 }
 0xc1a   :  { %2134 = vadd.xlane.f32.xlu1 %v2133_v23 }
 0xc1b   :  { %v5191_v57 = vpop.eup %5190 }
 0xc1c   :  { %v2293_v24 = vsel %vm1807_vm12, %v5191_v57, 0.0 }
 0xc1d   :  { %2294 = vadd.xlane.f32.xlu0 %v2293_v24  ;;  %v1491_v24 = vld [vmem:[#allocation2 + $0x1b0] sm:$0xff] }
 0xca2   :  { %v1975_v29 = vpop.xlane.xlu0 %1974 }
 0xca3   :  { %v1816_v25 = vpop.xlane.xlu1 %1815 }
 0xca4   :  { %5192 = vrcp.f32 %v1816_v25  ;;  %v1492_v25 = vld [vmem:[#allocation2 + $0x1b8] sm:$0xff] }
 0xca5   :  { %5194 = vrcp.f32 %v1975_v29  ;;  %v5072_v29 = vpack.c.bf16 %v1492_v25, %v1491_v24  ;;  %v2655_v25 = vld [vmem:[#allocation2 + $0x220] sm:$0xff] }
 0xca7   :  { %v2135_v30 = vpop.xlane.xlu1 %2134 }
 0xca8   :  { %5196 = vrcp.f32 %v2135_v30  ;;  %v1493_v30 = vld [vmem:[#allocation2 + $0x1c0] sm:$0xff] }
 0xcaa   :  { %v2295_v34 = vpop.xlane.xlu0 %2294 }
 0xcab   :  { %5198 = vrcp.f32 %v2295_v34  ;;  %v1494_v34 = vld [vmem:[#allocation2 + $0x1c8] sm:$0xff] }
 0xcae   :  { %v5193_v35 = vpop.eup %5192 }
 0xcaf   :  { %v1818_v36 = vmul.f32 %v5193_v35, %v5187_v19  ;;  %v5195_v39 = vpop.eup %5194  ;;  %v5075_v35 = vpack.c.bf16 %v1494_v34, %v1493_v30  ;;  %v2663_v34 = vld [vmem:[#allocation2 + $0x260] sm:$0xff] }
 0xcb0   :  { %v1977_v40 = vmul.f32 %v5195_v39, %v5185_v18  ;;  %v1497_v39 = vld [vmem:[#allocation2 + $0x1e0] sm:$0xff] }
 0xcb1   :  { %4739 = vmatmul.mubr.msk.f32.vlgmr.msra.gmra.mrb[20].mxu1 %vm1807_vm12, %v1818_v36  ;;  %v1496_v36 = vld [vmem:[#allocation2 + $0x1d8] sm:$0xff] }
 0xcb2   :  { %4747 = vmatpush3.msra.mxu1 %v5612_v48  ;;  %4748 = vmatprep.mubr.msk.f32.mxu1 %vm5319_vm0, %v5320_v14  ;;  %v5197_v42 = vpop.eup %5196 }
 0xcb3   :  { %4756 = vmatprep.subr.mxu1 %v5320_v14  ;;  %v2137_v32 = vmul.f32 %v5197_v42, %v5189_v22  ;;  %v1498_v42 = vld [vmem:[#allocation2 + $0x1e8] sm:$0xff] }
 0xcb5   :  { %4749 = vmatmul.mubr.msk.f32.vlgmr.msra.gmra.mrb[22].mxu1 %vm1807_vm12, %v1977_v40  ;;  %v5199_v47 = vpop.eup %5198 }
 0xcb6   :  { %4757 = vmatpush3.msra.mxu1 %v5612_v48  ;;  %4758 = vmatprep.mubr.msk.f32.mxu1 %vm5319_vm0, %v5320_v14  ;;  %v2297_v56 = vmul.f32 %v5199_v47, %v5191_v57  ;;  %v1499_v47 = vld [vmem:[#allocation2 + $0x1f0] sm:$0xff] }
 0xcb7   :  { %4766 = vmatprep.subr.mxu1 %v5320_v14 }
 0xcb9   :  { %4759 = vmatmul.mubr.msk.f32.vlgmr.msra.gmra.mrb[24].mxu1 %vm1807_vm12, %v2137_v32  ;;  %v5081_v32 = vpack.c.bf16 %v1498_v42, %v1497_v39  ;;  %v2658_v39 = vld [vmem:[#allocation2 + $0x238] sm:$0xff] }
 0xcba   :  { %4767 = vmatpush3.msra.mxu1 %v5612_v48  ;;  %4768 = vmatprep.mubr.msk.f32.mxu1 %vm5319_vm0, %v5320_v14  ;;  %v5069_v48 = vpack.c.bf16 %v1490_v4, %v1489_v51  ;;  %v2467_v4 = vsub.s32 4, %v5356_v3 }
 0xcbb   :  { %5071 = vmatprep.subr.bf16.mxu1 %v5318_v2 }
 0xcbc   :  { %5070 = vmatpush3.bf16.msra.mxu0 %v5069_v48  ;;  %v2472_v48 = vsub.s32 5, %v5356_v3 }
 0xcbd   :  { %4769 = vmatmul.mubr.msk.f32.vlgmr.msra.gmra.mrb[26].mxu1 %vm1807_vm12, %v2297_v56  ;;  %5077 = vmatprep.subr.bf16.mxu0 %v5318_v2  ;;  %v1500_v56 = vld [vmem:[#allocation2 + $0x1f8] sm:$0xff] }
 0xcbe   :  { %4790 = vmatprep.mubr.msk.f32.mxu1 %vm5319_vm0, %v5320_v14  ;;  %5073 = vmatpush3.bf16.msra.mxu1 %v5072_v29  ;;  %v5084_v49 = vpack.c.bf16 %v1500_v56, %v1499_v47  ;;  %v2656_v29 = vld [vmem:[#allocation2 + $0x228] sm:$0xff] }
 0xcbf   :  { %5074 = vmatprep.subr.bf16.mxu1 %v5318_v2  ;;  %v5090_v30 = vpack.c.bf16 %v2656_v29, %v2655_v25 }
 0xcc2   :  { %5076 = vmatpush3.bf16.msra.mxu1 %v5075_v35  ;;  %v2664_v35 = vld [vmem:[#allocation2 + $0x268] sm:$0xff] }
 0xcc3   :  { %5089 = vmatprep.subr.bf16.mxu1 %v5318_v2 }
 0xd84   :  { %v1888_v52 = vpop.f32.mrb[20].mxu1 }
 0xd85   :  { %v4740_v21 = vpop.f32.mrb[21].mxu1  ;;  %v1892_v54 = vmul.f32 %v5583_v31, %v1888_v52  ;;  %v2468_v52 = vrot.slane %v5542_v63, %v2467_v4 }
 0xd88   :  { %v2047_v61 = vpop.f32.mrb[22].mxu1 }
 0xd89   :  { %v2051_v55 = vmul.f32 %v5586_v33, %v2047_v61  ;;  %v4750_v58 = vpop.f32.mrb[23].mxu1 }
 0xd8b   :  { %v2052_v59 = vadd.f32 %v2051_v55, %v1892_v54  ;;  %v2473_v54 = vrot.slane %v5542_v63, %v2472_v48 }
 0xd8c   :  { %v2207_v44 = vpop.f32.mrb[24].mxu1 }
 0xd8d   :  { %v2211_v0 = vmul.f32 %v5594_v41, %v2207_v44  ;;  %v4760_v5 = vpop.f32.mrb[25].mxu1  ;;  %v1502_v44 = vld [vmem:[#allocation2 + $0x208] sm:$0xff] }
 0xd8e   :  { %v1504_v5 = vld [vmem:[#allocation2 + $0x218] sm:$0x3] }
 0xd8f   :  { %v2212_v6 = vadd.f32 %v2211_v0, %v2052_v59  ;;  %v1501_v59 = vld [vmem:[#allocation2 + $0x200] sm:$0xff] }
 0xd90   :  { %v2367_v7 = vpop.f32.mrb[26].mxu1  ;;  %v5087_v0 = vpack.c.bf16 %v1502_v44, %v1501_v59 }
 0xd91   :  { %v2371_v8 = vmul.f32 %v5610_v43, %v2367_v7  ;;  %v4770_v9 = vpop.f32.mrb[27].mxu1 }
 0xd93   :  { %v2372_v11 = vadd.f32 %v2371_v8, %v2212_v6  ;;  %v2478_v6 = vrot.slane %v1504_v5, %v5540_v62 }
 0xd95   :  { %4780 = vmatmul.mubr.msk.f32.vlgmr.msra.gmra.mrb[24].mxu0 %vm379_vm13, %v2372_v11 }
 0xd96   :  { %4809 = vmatprep.mubr.msk.f32.mxu0 %vm5319_vm0, %v5320_v14 }
 0xe68   :  { %v2446_v15 = vpop.f32.mrb[24].mxu0 }
 0xe69   :  { %v2447_v16 = vadd.f32 %v2446_v15, %v2376_v13  ;;  %v4781_v17 = vpop.f32.mrb[25].mxu0  ;;  %v2555_v13 = vsub.s32 6, %v5356_v3 }
 0xe6b   :  { %v2450_v18 = vadd.f32 %v2447_v16, %v5532_v53  ;;  %v1495_v53 = vld [vmem:[#allocation2 + $0x1d0] sm:$0xff]  ;;  %v2556_v15 = vrot.slane %v5542_v63, %v2555_v13 }
 0xe6c   :  { %v5078_v40 = vpack.c.bf16 %v1496_v36, %v1495_v53  ;;  %v5102_v53 = vpack.c.bf16 %v2664_v35, %v2663_v34  ;;  %v2657_v36 = vld [vmem:[#allocation2 + $0x230] sm:$0xff] }
 0xe6d   :  { %v2451_v19 = vsel %vm379_vm13, %v2450_v18, 0.0  ;;  %v5093_v42 = vpack.c.bf16 %v2658_v39, %v2657_v36 }
 0xe6e   :  { %2452 = vadd.xlane.f32.xlu1 %v2451_v19  ;;  %5079 = vmatpush3.bf16.msra.mxu0 %v5078_v40  ;;  %v2665_v40 = vld [vmem:[#allocation2 + $0x270] sm:$0xff] }
 0xe6f   :  { %5080 = vmatprep.subr.bf16.mxu0 %v5318_v2 }
 0xe72   :  { %5082 = vmatpush3.bf16.msra.mxu0 %v5081_v32  ;;  %v2666_v32 = vld [vmem:[#allocation2 + $0x278] sm:$0xff] }
 0xe73   :  { %5083 = vmatprep.subr.bf16.mxu0 %v5318_v2  ;;  %v5105_v47 = vpack.c.bf16 %v2666_v32, %v2665_v40 }
 0xe76   :  { %5085 = vmatpush3.bf16.msra.mxu0 %v5084_v49 }
 0xe77   :  { %5086 = vmatprep.subr.bf16.mxu0 %v5318_v2 }
 0xe7a   :  { %5088 = vmatpush3.bf16.msra.mxu0 %v5087_v0  ;;  %v2661_v0 = vld [vmem:[#allocation2 + $0x250] sm:$0xff] }
 0xe7b   :  { %5101 = vmatprep.subr.bf16.mxu0 %v5318_v2 }
 0xefb   :  { %v2453_v60 = vpop.xlane.xlu1 %2452 }
 0xefc   :  { %v2455_v37 = vmul.f32 0.03125, %v2453_v60 }
 0xefe   :  { %v2456_v22 = vsub.f32 %v2450_v18, %v2455_v37 }
 0xf00   :  { %v2457_v23 = vmul.f32 %v2456_v22, %v2456_v22 }
 0xf02   :  { %v2458_v57 = vsel %vm379_vm13, %v2457_v23, 0.0 }
 0xf03   :  { %2459 = vadd.xlane.f32.xlu0 %v2458_v57 }
 0xf90   :  { %v2460_v1 = vpop.xlane.xlu0 %2459 }
 0xf91   :  { %v2461_v50 = vmul.f32 0.03125, %v2460_v1 }
 0xf93   :  { %v2462_v51 = vadd.f32 1e-05, %v2461_v50  ;;  %v2647_v50 = vsub.s32 7, %v5356_v3  ;;  %v722_v3 = vsel %vm721_vm15, %v5471_v45, 0.0 }
 0xf95   :  { %5200 = vrsqrt.f32 %v2462_v51  ;;  %v2648_v51 = vrot.slane %v5542_v63, %v2647_v50 }
 0xf9f   :  { %v5201_v21 = vpop.eup %5200 }
 0xfa0   :  { %v2464_v61 = vmul.f32 %v5201_v21, %v2456_v22  ;;  %v2653_v21 = vrot.slane %v1504_v5, %v5451_v10 }
 0xfa2   :  { %v2469_v55 = vmul.f32 %v2468_v52, %v2464_v61 }
 0xfa4   :  { %v2474_v58 = vadd.f32 %v2473_v54, %v2469_v55  ;;  %v2659_v54 = vld [vmem:[#allocation2 + $0x240] sm:$0xff]  ;;  %v2660_v55 = vld [vmem:[#allocation2 + $0x248] sm:$0xff] }
 0xfa5   :  { %v5096_v59 = vpack.c.bf16 %v2660_v55, %v2659_v54 }
 0xfa6   :  { %4791 = vmatmul.mubr.msk.f32.vlgmr.msra.gmra.mrb[28].mxu1 %vm379_vm13, %v2474_v58 }
 0xfa7   :  { %4820 = vmatprep.mubr.msk.f32.mxu1 %vm5319_vm0, %v5320_v14  ;;  %5091 = vmatpush3.bf16.msra.mxu1 %v5090_v30 }
 0xfa8   :  { %5092 = vmatprep.subr.bf16.mxu1 %v5318_v2 }
 0xfab   :  { %5094 = vmatpush3.bf16.msra.mxu1 %v5093_v42 }
 0xfac   :  { %5095 = vmatprep.subr.bf16.mxu1 %v5318_v2 }
0x1079   :  { %v2548_v7 = vpop.f32.mrb[28].mxu1 }
0x107a   :  { %v2549_v8 = vadd.f32 %v2548_v7, %v2478_v6  ;;  %v4792_v9 = vpop.f32.mrb[29].mxu1  ;;  %v2662_v6 = vld [vmem:[#allocation2 + $0x258] sm:$0xff] }
0x107b   :  { %v5099_v63 = vpack.c.bf16 %v2662_v6, %v2661_v0 }
0x107c   :  { %v2552_v11 = vmax.f32 %v2549_v8, 0.0  ;;  %v5720_v8 = vld [vmem:[#allocation2 + $0x300] sm:$0xff] }
0x107e   :  { %4810 = vmatmul.mubr.msk.f32.vlgmr.msra.gmra.mrb[26].mxu0 %vm2557_vm14, %v2552_v11 }
0x107f   :  { %4842 = vmatprep.mubr.msk.f32.mxu0 %vm5319_vm0, %v5320_v14  ;;  %5103 = vmatpush3.bf16.msra.mxu0 %v5102_v53 }
0x1080   :  { %5104 = vmatprep.subr.bf16.mxu0 %v5318_v2 }
0x1083   :  { %5106 = vmatpush3.bf16.msra.mxu0 %v5105_v47 }
0x1084   :  { %4855 = vmatprep.subr.mxu0 %v5320_v14 }
0x1151   :  { %v2627_v16 = vpop.f32.mrb[26].mxu0 }
0x1152   :  { %v2628_v17 = vadd.f32 %v2627_v16, %v2556_v15  ;;  %v4811_v18 = vpop.f32.mrb[27].mxu0  ;;  %v2688_v15 = vrot.slane %v5720_v8, %v5451_v10  ;;  %v2765_v16 = vrot.slane %v5720_v8, %v5540_v62 }
0x1154   :  { %v2631_v19 = vadd.f32 %v2628_v17, %v2474_v58 }
0x1156   :  { %v2632_v60 = vsel %vm379_vm13, %v2631_v19, 0.0 }
0x1157   :  { %2633 = vadd.xlane.f32.xlu1 %v2632_v60 }
0x11e4   :  { %v2634_v37 = vpop.xlane.xlu1 %2633 }
0x11e5   :  { %v2635_v22 = vmul.f32 0.03125, %v2634_v37 }
0x11e7   :  { %v2636_v23 = vsub.f32 %v2631_v19, %v2635_v22  ;;  %v2839_v19 = vrot.slane %v5720_v8, %v1658_v38 }
0x11e9   :  { %v2637_v57 = vmul.f32 %v2636_v23, %v2636_v23 }
0x11eb   :  { %v2638_v24 = vsel %vm379_vm13, %v2637_v57, 0.0 }
0x11ec   :  { %2639 = vadd.xlane.f32.xlu0 %v2638_v24 }
0x1279   :  { %v2640_v56 = vpop.xlane.xlu0 %2639 }
0x127a   :  { %v2641_v49 = vmul.f32 0.03125, %v2640_v56 }
0x127c   :  { %v2642_v1 = vadd.f32 1e-05, %v2641_v49 }
0x127e   :  { %5202 = vrsqrt.f32 %v2642_v1 }
0x1288   :  { %v5203_v52 = vpop.eup %5202 }
0x1289   :  { %v2644_v61 = vmul.f32 %v5203_v52, %v2636_v23 }
0x128b   :  { %v2649_v58 = vmul.f32 %v2648_v51, %v2644_v61 }
0x128d   :  { %v5704_v44 = vadd.f32 %v2653_v21, %v2649_v58 }
0x128f   :  { %4821 = vmatmul.mubr.msk.f32.vlgmr.msra.gmra.mrb[30].mxu1 %vm379_vm13, %v5704_v44  ;;  %4843 = vmatmul.mubr.msk.f32.vlgmr.msra.gmra.mrb[28].mxu0 %vm379_vm13, %v5704_v44 }
0x1290   :  { %5097 = vmatpush3.bf16.msra.mxu1 %v5096_v59  ;;  %4831 = vmatprep.mubr.msk.f32.mxu1 %vm5319_vm0, %v5320_v14 }
0x1291   :  { %5098 = vmatprep.subr.bf16.mxu1 %v5318_v2  ;;  %4857 = vmatprep.mubr.msk.f32.mxu0 %vm5319_vm0, %v5320_v14 }
0x1294   :  { %5100 = vmatpush3.bf16.msra.mxu1 %v5099_v63 }
0x1295   :  { %4845 = vmatprep.subr.mxu1 %v5320_v14 }
0x1297   :  { %4832 = vmatmul.mubr.msk.f32.vlgmr.msra.gmra.mrb[32].mxu1 %vm379_vm13, %v5704_v44 }
0x1298   :  { %4847 = vmatprep.mubr.msk.f32.mxu1 %vm5319_vm0, %v5320_v14 }
0x1362   :  { %v2758_v5 = vpop.f32.mrb[30].mxu1  ;;  %v2906_v7 = vpop.f32.mrb[28].mxu0 }
0x1363   :  { %v4822_v9 = vpop.f32.mrb[31].mxu1  ;;  %v4844_v11 = vpop.f32.mrb[29].mxu0  ;;  %v2759_v17 = vadd.f32 %v2758_v5, %v2688_v15  ;;  %v5735_v57 = vadd.f32 %v2906_v7, %v2839_v19 }
0x1365   :  { %v2910_v22 = vmul.f32 %v5583_v31, %v2759_v17  ;;  %v3072_v23 = vmul.f32 %v5586_v33, %v2759_v17  ;;  %v3232_v38 = vmul.f32 %v5594_v41, %v2759_v17  ;;  %v3392_v24 = vmul.f32 %v5610_v43, %v2759_v17 }
0x136a   :  { %v2832_v18 = vpop.f32.mrb[32].mxu1 }
0x136b   :  { %v2833_v60 = vadd.f32 %v2832_v18, %v2765_v16  ;;  %v4833_v37 = vpop.f32.mrb[33].mxu1 }
0x136d   :  { %4846 = vmatpush3.xpose.msk.msra.mxu1 %vm379_vm13, %v2833_v60  ;;  %4856 = vmatpush3.xpose.msk.msra.mxu0 %vm379_vm13, %v2833_v60 }
0x136e   :  { %4850 = vmatprep.subr.mxu1 %v5320_v14  ;;  %4865 = vmatprep.subr.mxu0 %v5320_v14 }
0x1370   :  { %4848 = vmatmul.mubr.msk.f32.vlgmr.msra.gmra.mrb[34].mxu1 %vm379_vm13, %v2910_v22  ;;  %4858 = vmatmul.mubr.msk.f32.vlgmr.msra.gmra.mrb[30].mxu0 %vm379_vm13, %v3072_v23 }
0x1371   :  { %4851 = vmatpush3.msra.mxu1 %v5735_v57  ;;  %4866 = vmatpush3.xpose.msk.msra.mxu0 %vm379_vm13, %v2833_v60 }
0x1372   :  { %4867 = vmatprep.mubr.msk.f32.mxu0 %vm5319_vm0, %v5320_v14  ;;  %4875 = vmatprep.subr.mxu0 %v5320_v14 }
0x1373   :  { %4852 = vmatprep.mubr.msk.f32.mxu1 %vm5319_vm0, %v5320_v14  ;;  %4860 = vmatprep.subr.mxu1 %v5320_v14 }
0x1374   :  { %4868 = vmatmul.mubr.msk.f32.vlgmr.msra.gmra.mrb[32].mxu0 %vm379_vm13, %v3232_v38 }
0x1375   :  { %4876 = vmatpush3.xpose.msk.msra.mxu0 %vm379_vm13, %v2833_v60  ;;  %4877 = vmatprep.mubr.msk.f32.mxu0 %vm5319_vm0, %v5320_v14 }
0x1376   :  { %5107 = vmatprep.subr.bf16.mxu0 %v5318_v2 }
0x1378   :  { %4878 = vmatmul.mubr.msk.f32.vlgmr.msra.gmra.mrb[34].mxu0 %vm379_vm13, %v3392_v24 }
0x1379   :  { %4893 = vmatprep.mubr.msk.f32.mxu0 %vm5319_vm0, %v5320_v14 }
0x1443   :  { %v2983_v25 = vpop.f32.mrb[34].mxu1  ;;  %v3142_v29 = vpop.f32.mrb[30].mxu0 }
0x1444   :  { %v4849_v30 = vpop.f32.mrb[35].mxu1  ;;  %v4859_v34 = vpop.f32.mrb[31].mxu0  ;;  %v3146_v35 = vsel %vm1807_vm12, %v3142_v29, -inf  ;;  %v2987_v53 = vsel %vm1807_vm12, %v2983_v25, -inf }
0x1445   :  { %3147 = vmax.xlane.f32.xlu0 %v3146_v35  ;;  %2988 = vmax.xlane.f32.xlu1 %v2987_v53  ;;  %v2667_v34 = vld [vmem:[#allocation2 + $0x280] sm:$0xff]  ;;  %v2668_v35 = vld [vmem:[#allocation2 + $0x288] sm:$0xff] }
0x1446   :  { %v5108_v53 = vpack.c.bf16 %v2668_v35, %v2667_v34 }
0x1447   :  { %v3302_v36 = vpop.f32.mrb[32].mxu0 }
0x1448   :  { %v4869_v39 = vpop.f32.mrb[33].mxu0  ;;  %v3306_v40 = vsel %vm1807_vm12, %v3302_v36, -inf  ;;  %5109 = vmatpush3.bf16.msra.mxu0 %v5108_v53  ;;  %v3646_v53 = vrot.slane %v5720_v8, %v2467_v4  ;;  %v2684_v4 = vld [vmem:[#allocation2 + $0x308] sm:$0x3] }
0x1449   :  { %3307 = vmax.xlane.f32.xlu1 %v3306_v40  ;;  %5110 = vmatprep.subr.bf16.mxu0 %v5318_v2  ;;  %v2670_v39 = vld [vmem:[#allocation2 + $0x298] sm:$0xff] }
0x144b   :  { %v3462_v42 = vpop.f32.mrb[34].mxu0 }
0x144c   :  { %v4879_v32 = vpop.f32.mrb[35].mxu0  ;;  %v3466_v47 = vsel %vm1807_vm12, %v3462_v42, -inf }
0x144d   :  { %3467 = vmax.xlane.f32.xlu0 %v3466_v47 }
0x14d2   :  { %v3148_v56 = vpop.xlane.xlu0 %3147  ;;  %v2989_v49 = vpop.xlane.xlu1 %2988 }
0x14d3   :  { %v3149_v1 = vsub.f32 %v3142_v29, %v3148_v56  ;;  %v2990_v51 = vsub.f32 %v2983_v25, %v2989_v49 }
0x14d5   :  { %v3150_v52 = vmul.f32 1.442695, %v3149_v1  ;;  %v2991_v21 = vmul.f32 1.442695, %v2990_v51 }
0x14d6   :  { %v3308_v61 = vpop.xlane.xlu1 %3307 }
0x14d7   :  { %5204 = vpow2.f32 %v3150_v52  ;;  %v3309_v54 = vsub.f32 %v3302_v36, %v3308_v61  ;;  %v2669_v36 = vld [vmem:[#allocation2 + $0x290] sm:$0xff] }
0x14d8   :  { %5206 = vpow2.f32 %v2991_v21 }
0x14d9   :  { %v3310_v55 = vmul.f32 1.442695, %v3309_v54 }
0x14da   :  { %v3468_v58 = vpop.xlane.xlu0 %3467 }
0x14db   :  { %5208 = vpow2.f32 %v3310_v55  ;;  %v3469_v59 = vsub.f32 %v3462_v42, %v3468_v58 }
0x14dd   :  { %v3470_v0 = vmul.f32 1.442695, %v3469_v59 }
0x14df   :  { %5210 = vpow2.f32 %v3470_v0 }
0x14e1   :  { %v5205_v6 = vpop.eup %5204 }
0x14e2   :  { %v5207_v63 = vpop.eup %5206  ;;  %v3152_v5 = vsel %vm1807_vm12, %v5205_v6, 0.0 }
0x14e3   :  { %3153 = vadd.xlane.f32.xlu0 %v3152_v5  ;;  %v2993_v7 = vsel %vm1807_vm12, %v5207_v63, 0.0 }
0x14e4   :  { %2994 = vadd.xlane.f32.xlu1 %v2993_v7 }
0x14e5   :  { %v5209_v9 = vpop.eup %5208 }
0x14e6   :  { %v3312_v11 = vsel %vm1807_vm12, %v5209_v9, 0.0 }
0x14e8   :  { %3313 = vadd.xlane.f32.xlu1 %v3312_v11 }
0x14e9   :  { %v5211_v15 = vpop.eup %5210 }
0x14ea   :  { %v3472_v16 = vsel %vm1807_vm12, %v5211_v15, 0.0 }
0x14eb   :  { %3473 = vadd.xlane.f32.xlu0 %v3472_v16  ;;  %v2672_v16 = vld [vmem:[#allocation2 + $0x2a8] sm:$0xff] }
0x1570   :  { %v3154_v17 = vpop.xlane.xlu0 %3153 }
0x1571   :  { %v2995_v18 = vpop.xlane.xlu1 %2994 }
0x1572   :  { %5212 = vrcp.f32 %v2995_v18  ;;  %v2674_v18 = vld [vmem:[#allocation2 + $0x2b8] sm:$0xff] }
0x1573   :  { %5214 = vrcp.f32 %v3154_v17 }
0x1575   :  { %v3314_v19 = vpop.xlane.xlu1 %3313 }
0x1576   :  { %5216 = vrcp.f32 %v3314_v19 }
0x1578   :  { %v3474_v60 = vpop.xlane.xlu0 %3473 }
0x1579   :  { %5218 = vrcp.f32 %v3474_v60  ;;  %v2676_v60 = vld [vmem:[#allocation2 + $0x2c8] sm:$0xff] }
0x157c   :  { %v5213_v37 = vpop.eup %5212 }
0x157d   :  { %v2997_v22 = vmul.f32 %v5213_v37, %v5207_v63  ;;  %v5215_v23 = vpop.eup %5214  ;;  %v2677_v37 = vld [vmem:[#allocation2 + $0x2d0] sm:$0xff] }
0x157e   :  { %v3156_v38 = vmul.f32 %v5215_v23, %v5205_v6  ;;  %v2678_v23 = vld [vmem:[#allocation2 + $0x2d8] sm:$0xff] }
0x157f   :  { %4853 = vmatmul.mubr.msk.f32.vlgmr.msra.gmra.mrb[36].mxu1 %vm1807_vm12, %v2997_v22 }
0x1580   :  { %4861 = vmatpush3.msra.mxu1 %v5735_v57  ;;  %4862 = vmatprep.mubr.msk.f32.mxu1 %vm5319_vm0, %v5320_v14  ;;  %v5217_v24 = vpop.eup %5216 }
0x1581   :  { %4870 = vmatprep.subr.mxu1 %v5320_v14  ;;  %v3316_v25 = vmul.f32 %v5217_v24, %v5209_v9  ;;  %v2679_v24 = vld [vmem:[#allocation2 + $0x2e0] sm:$0xff] }
0x1583   :  { %4863 = vmatmul.mubr.msk.f32.vlgmr.msra.gmra.mrb[38].mxu1 %vm1807_vm12, %v3156_v38  ;;  %v5219_v29 = vpop.eup %5218  ;;  %v5123_v38 = vpack.c.bf16 %v2678_v23, %v2677_v37 }
0x1584   :  { %4871 = vmatpush3.msra.mxu1 %v5735_v57  ;;  %4872 = vmatprep.mubr.msk.f32.mxu1 %vm5319_vm0, %v5320_v14  ;;  %v3476_v30 = vmul.f32 %v5219_v29, %v5211_v15  ;;  %v2671_v15 = vld [vmem:[#allocation2 + $0x2a0] sm:$0xff] }
0x1585   :  { %4880 = vmatprep.subr.mxu1 %v5320_v14  ;;  %v5114_v17 = vpack.c.bf16 %v2672_v16, %v2671_v15 }
0x1587   :  { %4873 = vmatmul.mubr.msk.f32.vlgmr.msra.gmra.mrb[40].mxu1 %vm1807_vm12, %v3316_v25  ;;  %v2680_v25 = vld [vmem:[#allocation2 + $0x2e8] sm:$0xff] }
0x1588   :  { %4881 = vmatpush3.msra.mxu1 %v5735_v57  ;;  %4882 = vmatprep.mubr.msk.f32.mxu1 %vm5319_vm0, %v5320_v14  ;;  %v5111_v57 = vpack.c.bf16 %v2670_v39, %v2669_v36  ;;  %v5126_v29 = vpack.c.bf16 %v2680_v25, %v2679_v24 }
0x1589   :  { %5113 = vmatprep.subr.bf16.mxu1 %v5318_v2 }
0x158a   :  { %5112 = vmatpush3.bf16.msra.mxu0 %v5111_v57  ;;  %v3651_v57 = vrot.slane %v5720_v8, %v2472_v48 }
0x158b   :  { %4883 = vmatmul.mubr.msk.f32.vlgmr.msra.gmra.mrb[42].mxu1 %vm1807_vm12, %v3476_v30  ;;  %5119 = vmatprep.subr.bf16.mxu0 %v5318_v2 }
0x158c   :  { %4904 = vmatprep.mubr.msk.f32.mxu1 %vm5319_vm0, %v5320_v14  ;;  %5115 = vmatpush3.bf16.msra.mxu1 %v5114_v17 }
0x158d   :  { %5116 = vmatprep.subr.bf16.mxu1 %v5318_v2 }
0x1652   :  { %v3067_v40 = vpop.f32.mrb[36].mxu1 }
0x1653   :  { %v4854_v42 = vpop.f32.mrb[37].mxu1  ;;  %v3071_v47 = vmul.f32 %v5583_v31, %v3067_v40  ;;  %v3555_v31 = vrot.slane %v5720_v8, %v2375_v12  ;;  %v2673_v12 = vld [vmem:[#allocation2 + $0x2b0] sm:$0xff] }
0x1654   :  { %v5117_v19 = vpack.c.bf16 %v2674_v18, %v2673_v12  ;;  %v1405_v12 = vld [vmem:[#allocation2 + $0x318] sm:$0xf] }
0x1656   :  { %v3226_v32 = vpop.f32.mrb[38].mxu1  ;;  %5118 = vmatpush3.bf16.msra.mxu1 %v5117_v19 }
0x1657   :  { %v3230_v56 = vmul.f32 %v5586_v33, %v3226_v32  ;;  %v4864_v49 = vpop.f32.mrb[39].mxu1  ;;  %4926 = vmatprep.subr.mxu1 %v5320_v14  ;;  %v2681_v32 = vld [vmem:[#allocation2 + $0x2f0] sm:$0xff] }
0x1658   :  { %v3656_v49 = vrot.slane %v2684_v4, %v5540_v62 }
0x1659   :  { %v3231_v1 = vadd.f32 %v3230_v56, %v3071_v47  ;;  %v2682_v47 = vld [vmem:[#allocation2 + $0x2f8] sm:$0xff] }
0x165a   :  { %v3386_v51 = vpop.f32.mrb[40].mxu1  ;;  %v5129_v56 = vpack.c.bf16 %v2682_v47, %v2681_v32 }
0x165b   :  { %v3390_v52 = vmul.f32 %v5594_v41, %v3386_v51  ;;  %v4874_v21 = vpop.f32.mrb[41].mxu1 }
0x165c   :  { %v3734_v21 = vrot.slane %v5720_v8, %v2555_v13  ;;  %v3825_v13 = vrot.slane %v5720_v8, %v2647_v50  ;;  %v1061_v50 = vsel %vm721_vm15, %v5500_v26, 0.0  ;;  %v1400_v8 = vsel %vm721_vm15, %v5552_v20, 0.0 }
0x165d   :  { %v3391_v61 = vadd.f32 %v3390_v52, %v3231_v1 }
0x165e   :  { %v3546_v54 = vpop.f32.mrb[42].mxu1 }
0x165f   :  { %v3550_v55 = vmul.f32 %v5610_v43, %v3546_v54  ;;  %v4884_v58 = vpop.f32.mrb[43].mxu1 }
0x1661   :  { %v3551_v59 = vadd.f32 %v3550_v55, %v3391_v61 }
0x1663   :  { %4894 = vmatmul.mubr.msk.f32.vlgmr.msra.gmra.mrb[36].mxu0 %vm379_vm13, %v3551_v59 }
0x1664   :  { %4923 = vmatprep.mubr.msk.f32.mxu0 %vm5319_vm0, %v5320_v14 }
0x1736   :  { %v3625_v33 = vpop.f32.mrb[36].mxu0 }
0x1737   :  { %v3626_v0 = vadd.f32 %v3625_v33, %v3555_v31  ;;  %v4895_v6 = vpop.f32.mrb[37].mxu0 }
0x1739   :  { %v3629_v41 = vadd.f32 %v3626_v0, %v5704_v44  ;;  %v2675_v44 = vld [vmem:[#allocation2 + $0x2c0] sm:$0xff] }
0x173a   :  { %v5120_v22 = vpack.c.bf16 %v2676_v60, %v2675_v44 }
0x173b   :  { %v3630_v63 = vsel %vm379_vm13, %v3629_v41, 0.0 }
0x173c   :  { %3631 = vadd.xlane.f32.xlu1 %v3630_v63  ;;  %5121 = vmatpush3.bf16.msra.mxu0 %v5120_v22 }
0x173d   :  { %5122 = vmatprep.subr.bf16.mxu0 %v5318_v2 }
0x1740   :  { %5124 = vmatpush3.bf16.msra.mxu0 %v5123_v38 }
0x1741   :  { %5125 = vmatprep.subr.bf16.mxu0 %v5318_v2 }
0x1744   :  { %5127 = vmatpush3.bf16.msra.mxu0 %v5126_v29  ;;  %v3832_v29 = vld [vmem:[#allocation2 + $0x310] sm:$0x3] }
0x1745   :  { %5128 = vmatprep.subr.bf16.mxu0 %v5318_v2  ;;  %v3849_v45 = vrot.slane %v3832_v29, %v5451_v10 }
0x1748   :  { %5130 = vmatpush3.bf16.msra.mxu0 %v5129_v56 }
0x1749   :  { %5143 = vmatprep.subr.bf16.mxu0 %v5318_v2 }
0x17c9   :  { %v3632_v43 = vpop.xlane.xlu1 %3631 }
0x17ca   :  { %v3633_v5 = vmul.f32 0.03125, %v3632_v43 }
0x17cc   :  { %v3634_v7 = vsub.f32 %v3629_v41, %v3633_v5 }
0x17ce   :  { %v3635_v9 = vmul.f32 %v3634_v7, %v3634_v7 }
0x17d0   :  { %v3636_v11 = vsel %vm379_vm13, %v3635_v9, 0.0 }
0x17d1   :  { %3637 = vadd.xlane.f32.xlu0 %v3636_v11  ;;  %v3830_v11 = vrot.slane %v2684_v4, %v5451_v10  ;;  %v3859_v10 = vrot.slane %v1405_v12, 2 }
0x185e   :  { %v3638_v30 = vpop.xlane.xlu0 %3637 }
0x185f   :  { %v3639_v34 = vmul.f32 0.03125, %v3638_v30 }
0x1861   :  { %v3640_v35 = vadd.f32 1e-05, %v3639_v34 }
0x1863   :  { %5220 = vrsqrt.f32 %v3640_v35 }
0x186d   :  { %v5221_v36 = vpop.eup %5220 }
0x186e   :  { %v3642_v39 = vmul.f32 %v5221_v36, %v3634_v7 }
0x1870   :  { %v3647_v40 = vmul.f32 %v3646_v53, %v3642_v39  ;;  %v3854_v53 = vrot.slane %v3832_v29, %v5540_v62 }
0x1872   :  { %v3652_v42 = vadd.f32 %v3651_v57, %v3647_v40 }
0x1874   :  { %4905 = vmatmul.mubr.msk.f32.vlgmr.msra.gmra.mrb[44].mxu1 %vm379_vm13, %v3652_v42 }
0x1875   :  { %4928 = vmatprep.mubr.msk.f32.mxu1 %vm5319_vm0, %v5320_v14 }
0x1947   :  { %v3726_v1 = vpop.f32.mrb[44].mxu1 }
0x1948   :  { %v3727_v51 = vadd.f32 %v3726_v1, %v3656_v49  ;;  %v4906_v52 = vpop.f32.mrb[45].mxu1  ;;  %v1412_v49 = vrot.slane %v1405_v12, 1 }
0x194a   :  { %v3730_v48 = vmax.f32 %v3727_v51, 0.0 }
0x194c   :  { %4924 = vmatmul.mubr.msk.f32.vlgmr.msra.gmra.mrb[38].mxu0 %vm2557_vm14, %v3730_v48 }
0x194d   :  { %4966 = vmatprep.mubr.msk.f32.mxu0 %vm5319_vm0, %v5320_v14 }
0x1a1f   :  { %v3804_v61 = vpop.f32.mrb[38].mxu0 }
0x1a20   :  { %v3805_v54 = vadd.f32 %v3804_v61, %v3734_v21  ;;  %v4925_v55 = vpop.f32.mrb[39].mxu0 }
0x1a22   :  { %v3808_v58 = vadd.f32 %v3805_v54, %v3652_v42 }
0x1a24   :  { %v3809_v59 = vsel %vm379_vm13, %v3808_v58, 0.0 }
0x1a25   :  { %3810 = vadd.xlane.f32.xlu1 %v3809_v59 }
0x1ab2   :  { %v3811_v31 = vpop.xlane.xlu1 %3810 }
0x1ab3   :  { %v3812_v33 = vmul.f32 0.03125, %v3811_v31 }
0x1ab5   :  { %v3813_v0 = vsub.f32 %v3808_v58, %v3812_v33 }
0x1ab7   :  { %v3814_v6 = vmul.f32 %v3813_v0, %v3813_v0 }
0x1ab9   :  { %v3815_v41 = vsel %vm379_vm13, %v3814_v6, 0.0 }
0x1aba   :  { %3816 = vadd.xlane.f32.xlu0 %v3815_v41 }
0x1b47   :  { %v3817_v63 = vpop.xlane.xlu0 %3816 }
0x1b48   :  { %v3818_v43 = vmul.f32 0.03125, %v3817_v63 }
0x1b4a   :  { %v3819_v5 = vadd.f32 1e-05, %v3818_v43 }
0x1b4c   :  { %5222 = vrsqrt.f32 %v3819_v5 }
0x1b56   :  { %v5223_v7 = vpop.eup %5222 }
0x1b57   :  { %v3821_v9 = vmul.f32 %v5223_v7, %v3813_v0 }
0x1b59   :  { %v3826_v15 = vmul.f32 %v3825_v13, %v3821_v9 }
0x1b5b   :  { %v3831_v16 = vadd.f32 %v3830_v11, %v3826_v15 }
0x1b5d   :  { %v3833_v17 = vsel %vm379_vm13, %v3831_v16, 0.0 }
0x1b5e   :  { %3834 = vadd.xlane.f32.xlu1 %v3833_v17 }
0x1b6f   :  { %3857 = vperm.xlu1 %5161, %v1405_v12  }
0x1beb   :  { %v3835_v18 = vpop.xlane.xlu1 %3834 }
0x1bec   :  { %v3836_v19 = vmul.f32 0.03125, %v3835_v18 }
0x1bee   :  { %v3837_v44 = vsub.f32 %v3831_v16, %v3836_v19 }
0x1bef   :  { %v3858_v1 = vpop.permute.xlu1 %3857 }
0x1bf0   :  { %v3838_v60 = vmul.f32 %v3837_v44, %v3837_v44 }
0x1bf2   :  { %v3839_v37 = vsel %vm379_vm13, %v3838_v60, 0.0 }
0x1bf3   :  { %3840 = vadd.xlane.f32.xlu0 %v3839_v37  ;;  %v3860_v37 = vrot.slane %v3858_v1, 3  ;;  %v4027_v1 = vld [vmem:[#allocation2 + $0x338] sm:$0xff] }
0x1bf7   :  { %723 = vadd.xlane.f32.xlu0 %v722_v3 }
0x1bfb   :  { %1062 = vadd.xlane.f32.xlu0 %v1061_v50 }
0x1bff   :  { %1401 = vadd.xlane.f32.xlu0 %v1400_v8 }
0x1c80   :  { %v3841_v22 = vpop.xlane.xlu0 %3840 }
0x1c81   :  { %v3842_v23 = vmul.f32 0.03125, %v3841_v22 }
0x1c83   :  { %v3843_v38 = vadd.f32 1e-05, %v3842_v23 }
0x1c84   :  { %v724_v24 = vpop.xlane.xlu0 %723 }
0x1c85   :  { %5224 = vrsqrt.f32 %v3843_v38 }
0x1c86   :  { %5226 = vrcp.f32 %v724_v24 }
0x1c88   :  { %v1063_v25 = vpop.xlane.xlu0 %1062 }
0x1c89   :  { %5228 = vrcp.f32 %v1063_v25 }
0x1c8c   :  { %v1402_v30 = vpop.xlane.xlu0 %1401 }
0x1c8d   :  { %5230 = vrcp.f32 %v1402_v30 }
0x1c8f   :  { %v5225_v34 = vpop.eup %5224 }
0x1c90   :  { %v5227_v35 = vpop.eup %5226  ;;  %v3845_v26 = vmul.f32 %v5225_v34, %v3837_v44  ;;  %v4029_v34 = vld [vmem:[#allocation2 + $0x348] sm:$0xff] }
0x1c91   :  { %v5834_v20 = vmul.f32 %v5227_v35, %v5480_v46 }
0x1c92   :  { %v3850_v36 = vmul.f32 %v3849_v45, %v3845_v26  ;;  %v4028_v45 = vld [vmem:[#allocation2 + $0x340] sm:$0xff]  ;;  %v4030_v26 = vld [vmem:[#allocation2 + $0x350] sm:$0xff] }
0x1c93   :  { %v5229_v39 = vpop.eup %5228  ;;  %v1406_v57 = vmul.f32 %v1405_v12, %v5834_v20  ;;  %v5132_v35 = vpack.c.bf16 %v4029_v34, %v4028_v45 }
0x1c94   :  { %v3855_v40 = vadd.f32 %v3854_v53, %v3850_v36  ;;  %v5838_v42 = vmul.f32 %v5229_v39, %v5509_v27  ;;  %v4031_v53 = vld [vmem:[#allocation2 + $0x358] sm:$0xff] }
0x1c95   :  { %v1408_v32 = vsel %vm1407_vm1, %v1406_v57, 0.0  ;;  %v5135_v36 = vpack.c.bf16 %v4031_v53, %v4030_v26 }
0x1c96   :  { %1409 = vadd.xlane.f32.xlu0 %v1408_v32  ;;  %4927 = vmatpush3.xpose.msk.msra.mxu1 %vm379_vm13, %v3855_v40  ;;  %v1421_v62 = vmul.f32 %v1405_v12, %v5838_v42  ;;  %v4024_v32 = vld [vmem:[#allocation2 + $0x320] sm:$0xff] }
0x1c97   :  { %v5231_v47 = vpop.eup %5230  ;;  %4931 = vmatprep.subr.mxu1 %v5320_v14 }
0x1c98   :  { %v1422_v46 = vsel %vm1407_vm1, %v1421_v62, 0.0  ;;  %v5846_v56 = vmul.f32 %v5231_v47, %v5573_v28 }
0x1c99   :  { %4929 = vmatmul.mubr.msk.f32.vlgmr.msra.gmra.mrb[46].mxu1 %vm379_vm13, %v3859_v10  ;;  %1423 = vadd.xlane.f32.xlu1 %v1422_v46  ;;  %v4025_v10 = vld [vmem:[#allocation2 + $0x328] sm:$0xff] }
0x1c9a   :  { %4932 = vmatpush3.msra.mxu1 %v3855_v40  ;;  %v1432_v27 = vmul.f32 %v1405_v12, %v5846_v56  ;;  %4933 = vmatprep.mubr.msk.f32.mxu1 %vm5319_vm0, %v5320_v14  ;;  %v5138_v46 = vpack.c.bf16 %v4025_v10, %v4024_v32 }
0x1c9b   :  { %5131 = vmatprep.subr.bf16.mxu1 %v5318_v2 }
0x1c9c   :  { %v1433_v4 = vsel %vm1407_vm1, %v1432_v27, 0.0 }
0x1c9d   :  { %1434 = vadd.xlane.f32.xlu0 %v1433_v4 }
0x1d23   :  { %v1410_v51 = vpop.xlane.xlu0 %1409 }
0x1d24   :  { %v1414_v52 = vadd.f32 %v1412_v49, %v1410_v51 }
0x1d26   :  { %v4338_v28 = vmul.f32 -1.442695, %v1414_v52  ;;  %v1424_v48 = vpop.xlane.xlu1 %1423 }
0x1d27   :  { %v1425_v21 = vadd.f32 %v1424_v48, %v1412_v49 }
0x1d28   :  { %5232 = vpow2.f32 %v4338_v28 }
0x1d29   :  { %v4339_v61 = vmul.f32 -1.442695, %v1425_v21 }
0x1d2a   :  { %v1435_v54 = vpop.xlane.xlu0 %1434 }
0x1d2b   :  { %5234 = vpow2.f32 %v4339_v61  ;;  %v1436_v55 = vadd.f32 %v1435_v54, %v1412_v49  ;;  %v4026_v49 = vld [vmem:[#allocation2 + $0x330] sm:$0xff] }
0x1d2c   :  { %v5141_v28 = vpack.c.bf16 %v4027_v1, %v4026_v49 }
0x1d2d   :  { %v4340_v58 = vmul.f32 -1.442695, %v1436_v55  ;;  %v4183_v55 = vld [vmem:[#allocation2 + $0x360] sm:$0xff] }
0x1d2f   :  { %5236 = vpow2.f32 %v4340_v58 }
0x1d32   :  { %v5233_v59 = vpop.eup %5232 }
0x1d33   :  { %v1418_v31 = vadd.f32 1.0, %v5233_v59  ;;  %v4185_v59 = vld [vmem:[#allocation2 + $0x370] sm:$0xff] }
0x1d35   :  { %v5235_v33 = vpop.eup %5234  ;;  %5238 = vrcp.f32 %v1418_v31  ;;  %v4186_v31 = vld [vmem:[#allocation2 + $0x378] sm:$0xff] }
0x1d36   :  { %v1429_v0 = vadd.f32 1.0, %v5235_v33 }
0x1d38   :  { %5240 = vrcp.f32 %v1429_v0 }
0x1d39   :  { %v5237_v6 = vpop.eup %5236 }
0x1d3a   :  { %v1440_v41 = vadd.f32 1.0, %v5237_v6 }
0x1d3c   :  { %5242 = vrcp.f32 %v1440_v41 }
0x1d3f   :  { %v5239_v63 = vpop.eup %5238 }
0x1d40   :  { %v1443_v5 = vmul.f32 1.442695, %v5239_v63  ;;  %v4187_v63 = vld [vmem:[#allocation2 + $0x380] sm:$0x1] }
0x1d42   :  { %v5241_v43 = vpop.eup %5240 }
0x1d43   :  { %v1445_v13 = vmul.f32 1.442695, %v5241_v43 }
0x1d45   :  { %5244 = vpow2.f32 %v1445_v13 }
0x1d46   :  { %v5243_v7 = vpop.eup %5242  ;;  %5246 = vpow2.f32 %v1443_v5 }
0x1d47   :  { %v1447_v9 = vmul.f32 1.442695, %v5243_v7 }
0x1d49   :  { %5248 = vpow2.f32 %v1447_v9 }
0x1d4f   :  { %v5245_v11 = vpop.eup %5244 }
0x1d50   :  { %v5247_v15 = vpop.eup %5246 }
0x1d51   :  { %v1449_v16 = vadd.f32 %v5247_v15, %v5245_v11 }
0x1d53   :  { %v5249_v17 = vpop.eup %5248 }
0x1d54   :  { %v1450_v12 = vadd.f32 %v5249_v17, %v1449_v16 }
0x1d56   :  { %5250 = vrcp.f32 %v1450_v12 }
0x1d60   :  { %v5251_v18 = vpop.eup %5250 }
0x1d61   :  { %v1452_v19 = vmul.f32 %v5251_v18, %v5247_v15  ;;  %v1467_v44 = vmul.f32 %v5251_v18, %v5249_v17  ;;  %v1459_v60 = vmul.f32 %v5251_v18, %v5245_v11 }
0x1d63   :  { %1455 = vperm.xlu0 %5160, %v1452_v19  }
0x1d67   :  { %1462 = vperm.xlu0 %5160, %v1459_v60  }
0x1d6c   :  { %v3933_v3 = vpop.f32.mrb[46].mxu1 }
0x1d6d   :  { %v3934_v50 = vadd.f32 %v3933_v3, %v3860_v37  ;;  %v4930_v8 = vpop.f32.mrb[47].mxu1 }
0x1d6f   :  { %v4379_v22 = vmul.f32 -1.442695, %v3934_v50 }
0x1d71   :  { %5252 = vpow2.f32 %v4379_v22 }
0x1d7b   :  { %v5253_v23 = vpop.eup %5252 }
0x1d7c   :  { %v3940_v38 = vadd.f32 1.0, %v5253_v23 }
0x1d7e   :  { %5254 = vrcp.f32 %v3940_v38 }
0x1d88   :  { %v5255_v24 = vpop.eup %5254 }
0x1d89   :  { %v3943_v25 = vmul.f32 1.442695, %v5255_v24 }
0x1d8b   :  { %5256 = vpow2.f32 %v3943_v25 }
0x1d95   :  { %v5257_v29 = vpop.eup %5256 }
0x1d96   :  { %4934 = vmatmul.mubr.msk.f32.vlgmr.msra.gmra.mrb[48].mxu1 %vm1807_vm12, %v5257_v29  ;;  %v4019_v30 = vsel %vm4018_vm2, %v5257_v29, 0.0 }
0x1d97   :  { %4020 = vadd.xlane.f32.xlu0 %v4019_v30  ;;  %4944 = vmatprep.mubr.msk.f32.mxu1 %vm5319_vm0, %v5320_v14 }
0x1d98   :  { %5133 = vmatpush3.bf16.msra.mxu1 %v5132_v35 }
0x1d99   :  { %5134 = vmatprep.subr.bf16.mxu1 %v5318_v2 }
0x1d9c   :  { %5136 = vmatpush3.bf16.msra.mxu1 %v5135_v36 }
0x1d9d   :  { %5137 = vmatprep.subr.bf16.mxu1 %v5318_v2 }
0x1dad   :  { %1470 = vperm.xlu0 %5160, %v1467_v44  }
0x1de2   :  { %v1456_v39 = vpop.permute.xlu0 %1455 }
0x1de3   :  { %v1458_v48 = vmul.f32 %v1456_v39, %v5834_v20 }
0x1de6   :  { %v1463_v57 = vpop.permute.xlu0 %1462 }
0x1de7   :  { %v1465_v52 = vmul.f32 %v1463_v57, %v5838_v42  ;;  %v4184_v42 = vld [vmem:[#allocation2 + $0x368] sm:$0xff] }
0x1de8   :  { %v5144_v58 = vpack.c.bf16 %v4184_v42, %v4183_v55 }
0x1de9   :  { %v1466_v61 = vadd.f32 %v1465_v52, %v1458_v48 }
0x1dea   :  { %5145 = vmatpush3.bf16.msra.mxu0 %v5144_v58 }
0x1deb   :  { %5146 = vmatprep.subr.bf16.mxu0 %v5318_v2 }
0x1e24   :  { %v4021_v40 = vpop.xlane.xlu0 %4020 }
0x1e25   :  { %5258 = vrcp.f32 %v4021_v40 }
0x1e2c   :  { %v1471_v51 = vpop.permute.xlu0 %1470 }
0x1e2d   :  { %v1473_v21 = vmul.f32 %v1471_v51, %v5846_v56 }
0x1e2f   :  { %v5259_v62 = vpop.eup %5258  ;;  %v1474_v54 = vadd.f32 %v1473_v21, %v1466_v61 }
0x1e69   :  { %v4014_v47 = vpop.f32.mrb[48].mxu1 }
0x1e6a   :  { %v4023_v27 = vmul.f32 %v5259_v62, %v4014_v47  ;;  %v4935_v4 = vpop.f32.mrb[49].mxu1 }
0x1e6c   :  { %4945 = vmatmul.mubr.msk.f32.vlgmr.msra.gmra.mrb[50].mxu1 %vm379_vm13, %v4023_v27 }
0x1e6d   :  { %5139 = vmatpush3.bf16.msra.mxu1 %v5138_v46  ;;  %4955 = vmatprep.mubr.msk.f32.mxu1 %vm5319_vm0, %v5320_v14  ;;  %v5147_v14 = vpack.c.bf16 %v4186_v31, %v4185_v59 }
0x1e6e   :  { %5140 = vmatprep.subr.bf16.mxu1 %v5318_v2 }
0x1e6f   :  { %5148 = vmatpush3.bf16.msra.mxu0 %v5147_v14 }
0x1e71   :  { %5142 = vmatpush3.bf16.msra.mxu1 %v5141_v28 }
0x1e74   :  { %4956 = vmatmul.mubr.msk.f32.vlgmr.msra.gmra.mrb[50].mxu1 %vm379_vm13, %v1474_v54 }
0x1f47   :  { %v4174_v20 = vpop.f32.mrb[50].mxu1 }
0x1f48   :  { %v4179_v33 = vmul.f32 1.442695, %v4174_v20  ;;  %v4957_v56 = vpop.f32.mrb[51].mxu1  ;;  %vm4178_vm0 = vcmp.gt.f32.partialorder %v4174_v20, 0.0 }
0x1f4a   :  { %5260 = vpow2.f32 %v4179_v33 }
0x1f54   :  { %v5261_v0 = vpop.eup %5260 }
0x1f55   :  { %v4383_v6 = vadd.f32 -1.0, %v5261_v0 }
0x1f57   :  { %v4182_v41 = vsel %vm4178_vm0, %v4174_v20, %v4383_v6 }
0x1f58   :  { %4967 = vmatmul.mubr.msk.f32.vlgmr.msra.gmra.mrb[40].mxu0 %vm379_vm13, %v4182_v41 }
0x202b   :  { %v4257_v43 = vpop.f32.mrb[40].mxu0 }
0x202c   :  { %v4258_v5 = vadd.f32 %v4257_v43, %v4187_v63  ;;  %v4968_v13 = vpop.f32.mrb[41].mxu0 }
0x202e   :  { %v4262_v2 = vsel %vm4261_vm3, %v4258_v5, -inf }
0x202f   :  { %4263 = vmax.xlane.f32.xlu1 %v4262_v2 }
0x20bc   :  { %v4264_v7 = vpop.xlane.xlu1 %4263 }
0x20bd   :  { %v4265_v9 = vsub.f32 %v4258_v5, %v4264_v7 }
0x20bf   :  { %v4266_v11 = vmul.f32 1.442695, %v4265_v9 }
0x20c1   :  { %5262 = vpow2.f32 %v4266_v11 }
0x20cb   :  { %v5263_v15 = vpop.eup %5262 }
0x20cc   :  { %v4268_v16 = vsel %vm4261_vm3, %v5263_v15, 0.0 }
0x20cd   :  { %4269 = vadd.xlane.f32.xlu0 %v4268_v16 }
0x215a   :  { %v4270_v17 = vpop.xlane.xlu0 %4269 }
0x215b   :  { %5264 = vrcp.f32 %v4270_v17 }
0x2165   :  { %v5265_v12 = vpop.eup %5264 }
0x2166   :  { %v4272_v18 = vmul.f32 %v5265_v12, %v5263_v15 }
0x2168   :  { %4273 = vst.msk [vmem:[#allocation5] sm:$0x1] %vm4261_vm3, %v4272_v18 }
0x2169   :  { %5299 = shalt.err (!%p5296_p12)
}
0x216a   :  { %s5300_s12 = scalar_lea.hbm %s5887_s3, 16 }
0x216b   :  { %p5301_p13 = scmp.ne.s32.totalorder %s5887_s3, %s5300_s12  ;;  %p5304_p0 = scmp.lt.u32.totalorder %s5300_s12, %s5887_s3 }
0x216d   :  { %p5306_p1 = pnand %p5304_p0, %p5301_p13 }
0x216f   :  { %5309 = shalt.err (!%p5306_p1)
}
0x2170   :  { %4283 = dma.vmem_to_hbm [thread:$0]  %s4281_s7, 16, %s5887_s3, [#allocation4]  }
0x2171   :  { %5312 = dma.done.wait [#allocation4], 16  }
0x2172   :  { %5313 = vsyncadd [#allocation4], 4294967280 }
0x2173   :  { %4287 = vsyncpa [#allocation3], 1 }
0x2174   :  { %4288 = vsyncpa [#allocation4], 1 }

</bundles_post_ra>
